<compile_context>
chip_gen: v5e
topology: v5e:2x2
jax: 0.10.0
libtpu: 0.0.40
codegen_flags: <defaults>
</compile_context>

<pallas_src>
import functools

import jax
import jax.numpy as jnp
from jax.experimental import pallas as pl
from jax.experimental.pallas import tpu as pltpu


# --------------------------- fused seq2seq kernel -----------------------------
def _seq2seq_kernel(enc_x_ref, x0_ref,
                    enc_wih_ref, enc_gi_b_ref, enc_whh_ref, enc_gh_b_ref,
                    dec_wih_ref, dec_gi_b_ref, dec_whc_ref, dec_gh_b_ref,
                    gi_inc_b_ref, lin_w_ref, lin_b_ref,
                    out_ref, state_ref,
                    *, src_len, tgt_len, batch, hidden, out_size, residual):
    H = hidden
    B = batch
    f32 = jnp.float32
    bf16 = jnp.bfloat16

    # ---- preamble: bf16 weights loaded once; bias broadcasts hoisted out of loops.
    enc_whh = enc_whh_ref[...]                           # (H, 3H)       bf16
    dec_whc = dec_whc_ref[...]                           # (H, 6H)       bf16  [W_hh | C]
    lin_w = lin_w_ref[...]                               # (H, O)        bf16
    enc_gh_b = jnp.broadcast_to(enc_gh_b_ref[...], (B, 3 * H))
    dec_gh_b = jnp.broadcast_to(dec_gh_b_ref[...], (B, 3 * H))
    gi_inc_b = jnp.broadcast_to(gi_inc_b_ref[...], (B, 3 * H))
    lin_b = jnp.broadcast_to(lin_b_ref[...], (B, out_size))

    # ---- encoder input projection for ALL timesteps in one MXU op (off the chain).
    enc_gi_all = (jnp.dot(enc_x_ref[...].astype(bf16), enc_wih_ref[...],
                          preferred_element_type=f32)
                  + jnp.broadcast_to(enc_gi_b_ref[...], (src_len * B, 3 * H)))

    # Decoder gi_0 (depends only on the seed frame, not on the encoder chain).
    x = x0_ref[...]                                      # (B, O) f32
    gi = (jnp.dot(x.astype(bf16), dec_wih_ref[...], preferred_element_type=f32)
          + jnp.broadcast_to(dec_gi_b_ref[...], (B, 3 * H)))

    def gates(gi_t, gh_t, h_prev):
        # PyTorch GRU cell, (r, z, n) ordering. Biases are pre-folded:
        #   gi_t already holds b_ih (all) + b_hh (r,z columns); gh_t holds b_hh (n).
        rz = jax.nn.sigmoid(gi_t[:, :2 * H] + gh_t[:, :2 * H])   # one EUP push for r & z
        r = rz[:, :H]
        z = rz[:, H:]
        n = jnp.tanh(gi_t[:, 2 * H:] + r * gh_t[:, 2 * H:])
        return (1.0 - z) * n + z * h_prev

    # ---- encoder recurrence: single (B,H)x(H,3H) bf16 matmul per step on the chain.
    h = jnp.zeros((B, H), f32)
    for t in range(src_len):
        gh = (jnp.dot(h.astype(bf16), enc_whh, preferred_element_type=f32)
              + enc_gh_b)
        h = gates(enc_gi_all[t * B:(t + 1) * B], gh, h)

    # ---- decoder rollout: the output linear is folded into the next step's input
    #      projection, so only ONE fused (B,H)x(H,6H) matmul gates the next step.
    proj = jnp.dot(h.astype(bf16), dec_whc, preferred_element_type=f32)
    gh = proj[:, :3 * H] + dec_gh_b                      # gi part of h_enc unused
    for t in range(tgt_len):
        h = gates(gi, gh, h)
        # Critical chain: next-step projections [gh_{t+1} | gi_delta_{t+1}].
        proj = jnp.dot(h.astype(bf16), dec_whc, preferred_element_type=f32)
        gh = proj[:, :3 * H] + dec_gh_b
        if residual:
            gi = gi + proj[:, 3 * H:] + gi_inc_b
        else:
            gi = proj[:, 3 * H:] + gi_inc_b
        # Off-chain: frame for the output slab (and the residual carry).
        y = jnp.dot(h.astype(bf16), lin_w, preferred_element_type=f32) + lin_b
        frame = y + x if residual else y
        out_ref[:, t * out_size:(t + 1) * out_size] = frame
        x = frame

    state_ref[...] = h                                   # single state store


@functools.partial(jax.jit, static_argnames=("target_seq_len", "residual"))
def seq2seq_cvae_forward(params, encoder_input, decoder_input, *, target_seq_len,
                         residual):
    S, B, I = encoder_input.shape
    H = params["enc_w_hh"].shape[0]
    O = params["lin_w"].shape[1]
    f32 = jnp.float32
    bf16 = jnp.bfloat16

    # -------- one-time parameter prep (tiny, outside the kernel) --------
    def fold_bias(b_ih, b_hh):
        gi_b = jnp.concatenate(
            [b_ih[:, :2 * H] + b_hh[:, :2 * H], b_ih[:, 2 * H:]], axis=1)
        gh_b = jnp.concatenate(
            [jnp.zeros((1, 2 * H), f32), b_hh[:, 2 * H:]], axis=1)
        return gi_b, gh_b

    enc_gi_b, enc_gh_b = fold_bias(params["enc_b_ih"], params["enc_b_hh"])
    dec_gi_b, dec_gh_b = fold_bias(params["dec_b_ih"], params["dec_b_hh"])

    # Fold the decoder output linear into the next-step input projection:
    #   gi_{t+1} = gi_t + h_t @ C + c   (residual)    C = lin_w @ W_ih, c = lin_b @ W_ih
    #   gi_{t+1} = h_t @ C + c + gi_b   (non-residual)
    C = params["lin_w"] @ params["dec_w_ih"]                       # (H, 3H)
    c = params["lin_b"] @ params["dec_w_ih"]                       # (1, 3H)
    dec_whc = jnp.concatenate([params["dec_w_hh"], C], axis=1)     # (H, 6H)
    gi_inc_b = c if residual else c + dec_gi_b

    enc_x2d = encoder_input.reshape(S * B, I)    # free layout change (contiguous)
    x0 = decoder_input[0]                        # last_frame, (B, I)

    kernel = functools.partial(
        _seq2seq_kernel, src_len=S, tgt_len=target_seq_len, batch=B,
        hidden=H, out_size=O, residual=residual)
    vmem = pl.BlockSpec(memory_space=pltpu.MemorySpace.VMEM)

    out_slab, state = pl.pallas_call(
        kernel,
        out_shape=(
            jax.ShapeDtypeStruct((B, target_seq_len * O), f32),   # lane-dense slab
            jax.ShapeDtypeStruct((B, H), f32),
        ),
        in_specs=[vmem] * 13,
        out_specs=(vmem, vmem),
    )(enc_x2d, x0,
      params["enc_w_ih"].astype(bf16), enc_gi_b,
      params["enc_w_hh"].astype(bf16), enc_gh_b,
      params["dec_w_ih"].astype(bf16), dec_gi_b,
      dec_whc.astype(bf16), dec_gh_b,
      gi_inc_b, params["lin_w"].astype(bf16), params["lin_b"])

    outputs = out_slab.reshape(B, target_seq_len, O).transpose(1, 0, 2)  # (T, B, O)
    return outputs, state.reshape(1, B, H)       # match torch GRU state (1, B, H)


# ------------------------------ module wrapper --------------------------------
class Seq2SeqCVAEPallas:
    """Deterministic (stochastic=False) Seq2Seq_CVAE forward; params init'd in-script."""

    def __init__(self, encoder_hidden_size, decoder_hidden_size, residual,
                 output_size, num_keypoints, key):
        assert encoder_hidden_size == decoder_hidden_size, \
            "encoder state is fed to decoder GRU -> hidden sizes must match"
        self.input_size = num_keypoints * 2
        self.output_size = output_size
        assert self.output_size == self.input_size, \
            "DecoderWrapper asserts output_size == input_size"
        self.H = encoder_hidden_size
        self.residual = residual

        I, H, O = self.input_size, self.H, self.output_size
        ks = jax.random.split(key, 10)
        bound = 1.0 / jnp.sqrt(H)
        u = lambda k, shape, lo, hi: jax.random.uniform(
            k, shape, jnp.float32, minval=lo, maxval=hi)

        # Weights stored transposed to (in_features, 3H) / (H, O), PyTorch init ranges.
        self.params = dict(
            enc_w_ih=u(ks[0], (I, 3 * H), -bound, bound),
            enc_w_hh=u(ks[1], (H, 3 * H), -bound, bound),
            enc_b_ih=u(ks[2], (1, 3 * H), -bound, bound),
            enc_b_hh=u(ks[3], (1, 3 * H), -bound, bound),
            dec_w_ih=u(ks[4], (I, 3 * H), -bound, bound),
            dec_w_hh=u(ks[5], (H, 3 * H), -bound, bound),
            dec_b_ih=u(ks[6], (1, 3 * H), -bound, bound),
            dec_b_hh=u(ks[7], (1, 3 * H), -bound, bound),
            # DecoderWrapper.linear: weight ~ U(-0.04, 0.04), bias torch default
            lin_w=u(ks[8], (H, O), -0.04, 0.04),
            lin_b=u(ks[9], (1, O), -bound, bound),
        )

    def __call__(self, encoder_input, decoder_input, source_seq_len, target_seq_len):
        S, B, I = encoder_input.shape
        D, B2, I2 = decoder_input.shape
        assert I == I2 == self.input_size and B == B2
        # source_seq_len accepted but, as in the reference, the encoder consumes the
        # full encoder_input.
        return seq2seq_cvae_forward(self.params, encoder_input, decoder_input,
                                    target_seq_len=target_seq_len,
                                    residual=self.residual)


# ----------------------------------- main -------------------------------------
if __name__ == "__main__":
    num_keypoints = 8                 # input_size = output_size = 16
    hidden = 32
    batch = 4
    src_seq_len = 8
    target_seq_len = 8

    key = jax.random.PRNGKey(0)
    k_params, k_enc, k_dec = jax.random.split(key, 3)

    model = Seq2SeqCVAEPallas(
        encoder_hidden_size=hidden,
        decoder_hidden_size=hidden,
        residual=True,
        output_size=num_keypoints * 2,
        num_keypoints=num_keypoints,
        key=k_params,
    )

    encoder_input = jax.random.normal(
        k_enc, (src_seq_len, batch, num_keypoints * 2), jnp.float32)
    decoder_input = jax.random.normal(
        k_dec, (target_seq_len, batch, num_keypoints * 2), jnp.float32)

    outputs, state = model(encoder_input, decoder_input, src_seq_len, target_seq_len)
    jax.block_until_ready((outputs, state))

    assert outputs.shape == (target_seq_len, batch, num_keypoints * 2)
    assert state.shape == (1, batch, hidden)
    print("KERNEL_OK")
</pallas_src>

<mosaic_0001>
module attributes {stable_mosaic.version = 11 : i64} {
  func.func @_seq2seq_kernel(%arg0: memref<32x16xf32, #tpu.memory_space<vmem>>, %arg1: memref<4x16xf32, #tpu.memory_space<vmem>>, %arg2: memref<16x96xbf16, #tpu.memory_space<vmem>>, %arg3: memref<1x96xf32, #tpu.memory_space<vmem>>, %arg4: memref<32x96xbf16, #tpu.memory_space<vmem>>, %arg5: memref<1x96xf32, #tpu.memory_space<vmem>>, %arg6: memref<16x96xbf16, #tpu.memory_space<vmem>>, %arg7: memref<1x96xf32, #tpu.memory_space<vmem>>, %arg8: memref<32x192xbf16, #tpu.memory_space<vmem>>, %arg9: memref<1x96xf32, #tpu.memory_space<vmem>>, %arg10: memref<1x96xf32, #tpu.memory_space<vmem>>, %arg11: memref<32x16xbf16, #tpu.memory_space<vmem>>, %arg12: memref<1x16xf32, #tpu.memory_space<vmem>>, %arg13: memref<4x128xf32, #tpu.memory_space<vmem>>, %arg14: memref<4x32xf32, #tpu.memory_space<vmem>>) attributes {dimension_semantics = [], scalar_prefetch = 0 : i64, scratch_operands = 0 : i64, tpu.core_type = #tpu.core_type<tc>} {
    %c0 = arith.constant 0 : index
    %c0_0 = arith.constant 0 : index
    %0 = vector.load %arg4[%c0, %c0_0] : memref<32x96xbf16, #tpu.memory_space<vmem>>, vector<32x96xbf16>
    %c0_1 = arith.constant 0 : index
    %c0_2 = arith.constant 0 : index
    %1 = vector.load %arg8[%c0_1, %c0_2] : memref<32x192xbf16, #tpu.memory_space<vmem>>, vector<32x192xbf16>
    %c0_3 = arith.constant 0 : index
    %c0_4 = arith.constant 0 : index
    %2 = vector.load %arg11[%c0_3, %c0_4] : memref<32x16xbf16, #tpu.memory_space<vmem>>, vector<32x16xbf16>
    %c0_5 = arith.constant 0 : index
    %c0_6 = arith.constant 0 : index
    %3 = vector.load %arg5[%c0_5, %c0_6] : memref<1x96xf32, #tpu.memory_space<vmem>>, vector<1x96xf32>
    %4 = vector.shape_cast %3 : vector<1x96xf32> to vector<1x96xf32>
    %5 = vector.broadcast %4 : vector<1x96xf32> to vector<4x96xf32>
    %c0_7 = arith.constant 0 : index
    %c0_8 = arith.constant 0 : index
    %6 = vector.load %arg9[%c0_7, %c0_8] : memref<1x96xf32, #tpu.memory_space<vmem>>, vector<1x96xf32>
    %7 = vector.shape_cast %6 : vector<1x96xf32> to vector<1x96xf32>
    %8 = vector.broadcast %7 : vector<1x96xf32> to vector<4x96xf32>
    %c0_9 = arith.constant 0 : index
    %c0_10 = arith.constant 0 : index
    %9 = vector.load %arg10[%c0_9, %c0_10] : memref<1x96xf32, #tpu.memory_space<vmem>>, vector<1x96xf32>
    %10 = vector.shape_cast %9 : vector<1x96xf32> to vector<1x96xf32>
    %11 = vector.broadcast %10 : vector<1x96xf32> to vector<4x96xf32>
    %c0_11 = arith.constant 0 : index
    %c0_12 = arith.constant 0 : index
    %12 = vector.load %arg12[%c0_11, %c0_12] : memref<1x16xf32, #tpu.memory_space<vmem>>, vector<1x16xf32>
    %13 = vector.shape_cast %12 : vector<1x16xf32> to vector<1x16xf32>
    %14 = vector.broadcast %13 : vector<1x16xf32> to vector<4x16xf32>
    %c0_13 = arith.constant 0 : index
    %c0_14 = arith.constant 0 : index
    %15 = vector.load %arg0[%c0_13, %c0_14] : memref<32x16xf32, #tpu.memory_space<vmem>>, vector<32x16xf32>
    %16 = arith.truncf %15 : vector<32x16xf32> to vector<32x16xbf16>
    %c0_15 = arith.constant 0 : index
    %c0_16 = arith.constant 0 : index
    %17 = vector.load %arg2[%c0_15, %c0_16] : memref<16x96xbf16, #tpu.memory_space<vmem>>, vector<16x96xbf16>
    %cst = arith.constant dense<0.000000e+00> : vector<32x96xf32>
    %18 = tpu.matmul %16, %17, %cst {dimension_numbers = #tpu.dot_dimension_numbers<[1], [0], [0], [1], [0, 0, 1, 1], [], []>} : vector<32x16xbf16>, vector<16x96xbf16>, vector<32x96xf32> -> vector<32x96xf32>
    %c0_17 = arith.constant 0 : index
    %c0_18 = arith.constant 0 : index
    %19 = vector.load %arg3[%c0_17, %c0_18] : memref<1x96xf32, #tpu.memory_space<vmem>>, vector<1x96xf32>
    %20 = vector.shape_cast %19 : vector<1x96xf32> to vector<1x96xf32>
    %21 = vector.broadcast %20 : vector<1x96xf32> to vector<32x96xf32>
    %22 = arith.addf %18, %21 : vector<32x96xf32>
    %c0_19 = arith.constant 0 : index
    %c0_20 = arith.constant 0 : index
    %23 = vector.load %arg1[%c0_19, %c0_20] : memref<4x16xf32, #tpu.memory_space<vmem>>, vector<4x16xf32>
    %24 = arith.truncf %23 : vector<4x16xf32> to vector<4x16xbf16>
    %c0_21 = arith.constant 0 : index
    %c0_22 = arith.constant 0 : index
    %25 = vector.load %arg6[%c0_21, %c0_22] : memref<16x96xbf16, #tpu.memory_space<vmem>>, vector<16x96xbf16>
    %cst_23 = arith.constant dense<0.000000e+00> : vector<4x96xf32>
    %26 = tpu.matmul %24, %25, %cst_23 {dimension_numbers = #tpu.dot_dimension_numbers<[1], [0], [0], [1], [0, 0, 1, 1], [], []>} : vector<4x16xbf16>, vector<16x96xbf16>, vector<4x96xf32> -> vector<4x96xf32>
    %c0_24 = arith.constant 0 : index
    %c0_25 = arith.constant 0 : index
    %27 = vector.load %arg7[%c0_24, %c0_25] : memref<1x96xf32, #tpu.memory_space<vmem>>, vector<1x96xf32>
    %28 = vector.shape_cast %27 : vector<1x96xf32> to vector<1x96xf32>
    %29 = vector.broadcast %28 : vector<1x96xf32> to vector<4x96xf32>
    %30 = arith.addf %26, %29 : vector<4x96xf32>
    %cst_26 = arith.constant 0.000000e+00 : f32
    %31 = vector.broadcast %cst_26 : f32 to vector<4x32xf32>
    %32 = arith.truncf %31 : vector<4x32xf32> to vector<4x32xbf16>
    %cst_27 = arith.constant dense<0.000000e+00> : vector<4x96xf32>
    %33 = tpu.matmul %32, %0, %cst_27 {dimension_numbers = #tpu.dot_dimension_numbers<[1], [0], [0], [1], [0, 0, 1, 1], [], []>} : vector<4x32xbf16>, vector<32x96xbf16>, vector<4x96xf32> -> vector<4x96xf32>
    %34 = arith.addf %33, %5 : vector<4x96xf32>
    %35 = vector.extract_strided_slice %22 {offsets = [0, 0], sizes = [4, 96], strides = [1, 1]} : vector<32x96xf32> to vector<4x96xf32>
    %36 = vector.extract_strided_slice %35 {offsets = [0, 0], sizes = [4, 64], strides = [1, 1]} : vector<4x96xf32> to vector<4x64xf32>
    %37 = vector.extract_strided_slice %34 {offsets = [0, 0], sizes = [4, 64], strides = [1, 1]} : vector<4x96xf32> to vector<4x64xf32>
    %38 = arith.addf %36, %37 : vector<4x64xf32>
    %39 = arith.negf %38 : vector<4x64xf32>
    %40 = math.exp %39 : vector<4x64xf32>
    %cst_28 = arith.constant 1.000000e+00 : f32
    %41 = vector.broadcast %cst_28 : f32 to vector<4x64xf32>
    %42 = arith.addf %41, %40 : vector<4x64xf32>
    %43 = arith.divf %41, %42 : vector<4x64xf32>
    %44 = vector.extract_strided_slice %43 {offsets = [0, 0], sizes = [4, 32], strides = [1, 1]} : vector<4x64xf32> to vector<4x32xf32>
    %45 = vector.extract_strided_slice %43 {offsets = [0, 32], sizes = [4, 32], strides = [1, 1]} : vector<4x64xf32> to vector<4x32xf32>
    %46 = vector.extract_strided_slice %35 {offsets = [0, 64], sizes = [4, 32], strides = [1, 1]} : vector<4x96xf32> to vector<4x32xf32>
    %47 = vector.extract_strided_slice %34 {offsets = [0, 64], sizes = [4, 32], strides = [1, 1]} : vector<4x96xf32> to vector<4x32xf32>
    %48 = arith.mulf %44, %47 : vector<4x32xf32>
    %49 = arith.addf %46, %48 : vector<4x32xf32>
    %50 = math.tanh %49 : vector<4x32xf32>
    %cst_29 = arith.constant 1.000000e+00 : f32
    %51 = vector.broadcast %cst_29 : f32 to vector<4x32xf32>
    %52 = arith.subf %51, %45 : vector<4x32xf32>
    %53 = arith.mulf %52, %50 : vector<4x32xf32>
    %54 = arith.mulf %45, %31 : vector<4x32xf32>
    %55 = arith.addf %53, %54 : vector<4x32xf32>
    %56 = arith.truncf %55 : vector<4x32xf32> to vector<4x32xbf16>
    %cst_30 = arith.constant dense<0.000000e+00> : vector<4x96xf32>
    %57 = tpu.matmul %56, %0, %cst_30 {dimension_numbers = #tpu.dot_dimension_numbers<[1], [0], [0], [1], [0, 0, 1, 1], [], []>} : vector<4x32xbf16>, vector<32x96xbf16>, vector<4x96xf32> -> vector<4x96xf32>
    %58 = arith.addf %57, %5 : vector<4x96xf32>
    %59 = vector.extract_strided_slice %22 {offsets = [4, 0], sizes = [4, 96], strides = [1, 1]} : vector<32x96xf32> to vector<4x96xf32>
    %60 = vector.extract_strided_slice %59 {offsets = [0, 0], sizes = [4, 64], strides = [1, 1]} : vector<4x96xf32> to vector<4x64xf32>
    %61 = vector.extract_strided_slice %58 {offsets = [0, 0], sizes = [4, 64], strides = [1, 1]} : vector<4x96xf32> to vector<4x64xf32>
    %62 = arith.addf %60, %61 : vector<4x64xf32>
    %63 = arith.negf %62 : vector<4x64xf32>
    %64 = math.exp %63 : vector<4x64xf32>
    %cst_31 = arith.constant 1.000000e+00 : f32
    %65 = vector.broadcast %cst_31 : f32 to vector<4x64xf32>
    %66 = arith.addf %65, %64 : vector<4x64xf32>
    %67 = arith.divf %65, %66 : vector<4x64xf32>
    %68 = vector.extract_strided_slice %67 {offsets = [0, 0], sizes = [4, 32], strides = [1, 1]} : vector<4x64xf32> to vector<4x32xf32>
    %69 = vector.extract_strided_slice %67 {offsets = [0, 32], sizes = [4, 32], strides = [1, 1]} : vector<4x64xf32> to vector<4x32xf32>
    %70 = vector.extract_strided_slice %59 {offsets = [0, 64], sizes = [4, 32], strides = [1, 1]} : vector<4x96xf32> to vector<4x32xf32>
    %71 = vector.extract_strided_slice %58 {offsets = [0, 64], sizes = [4, 32], strides = [1, 1]} : vector<4x96xf32> to vector<4x32xf32>
    %72 = arith.mulf %68, %71 : vector<4x32xf32>
    %73 = arith.addf %70, %72 : vector<4x32xf32>
    %74 = math.tanh %73 : vector<4x32xf32>
    %cst_32 = arith.constant 1.000000e+00 : f32
    %75 = vector.broadcast %cst_32 : f32 to vector<4x32xf32>
    %76 = arith.subf %75, %69 : vector<4x32xf32>
    %77 = arith.mulf %76, %74 : vector<4x32xf32>
    %78 = arith.mulf %69, %55 : vector<4x32xf32>
    %79 = arith.addf %77, %78 : vector<4x32xf32>
    %80 = arith.truncf %79 : vector<4x32xf32> to vector<4x32xbf16>
    %cst_33 = arith.constant dense<0.000000e+00> : vector<4x96xf32>
    %81 = tpu.matmul %80, %0, %cst_33 {dimension_numbers = #tpu.dot_dimension_numbers<[1], [0], [0], [1], [0, 0, 1, 1], [], []>} : vector<4x32xbf16>, vector<32x96xbf16>, vector<4x96xf32> -> vector<4x96xf32>
    %82 = arith.addf %81, %5 : vector<4x96xf32>
    %83 = vector.extract_strided_slice %22 {offsets = [8, 0], sizes = [4, 96], strides = [1, 1]} : vector<32x96xf32> to vector<4x96xf32>
    %84 = vector.extract_strided_slice %83 {offsets = [0, 0], sizes = [4, 64], strides = [1, 1]} : vector<4x96xf32> to vector<4x64xf32>
    %85 = vector.extract_strided_slice %82 {offsets = [0, 0], sizes = [4, 64], strides = [1, 1]} : vector<4x96xf32> to vector<4x64xf32>
    %86 = arith.addf %84, %85 : vector<4x64xf32>
    %87 = arith.negf %86 : vector<4x64xf32>
    %88 = math.exp %87 : vector<4x64xf32>
    %cst_34 = arith.constant 1.000000e+00 : f32
    %89 = vector.broadcast %cst_34 : f32 to vector<4x64xf32>
    %90 = arith.addf %89, %88 : vector<4x64xf32>
    %91 = arith.divf %89, %90 : vector<4x64xf32>
    %92 = vector.extract_strided_slice %91 {offsets = [0, 0], sizes = [4, 32], strides = [1, 1]} : vector<4x64xf32> to vector<4x32xf32>
    %93 = vector.extract_strided_slice %91 {offsets = [0, 32], sizes = [4, 32], strides = [1, 1]} : vector<4x64xf32> to vector<4x32xf32>
    %94 = vector.extract_strided_slice %83 {offsets = [0, 64], sizes = [4, 32], strides = [1, 1]} : vector<4x96xf32> to vector<4x32xf32>
    %95 = vector.extract_strided_slice %82 {offsets = [0, 64], sizes = [4, 32], strides = [1, 1]} : vector<4x96xf32> to vector<4x32xf32>
    %96 = arith.mulf %92, %95 : vector<4x32xf32>
    %97 = arith.addf %94, %96 : vector<4x32xf32>
    %98 = math.tanh %97 : vector<4x32xf32>
    %cst_35 = arith.constant 1.000000e+00 : f32
    %99 = vector.broadcast %cst_35 : f32 to vector<4x32xf32>
    %100 = arith.subf %99, %93 : vector<4x32xf32>
    %101 = arith.mulf %100, %98 : vector<4x32xf32>
    %102 = arith.mulf %93, %79 : vector<4x32xf32>
    %103 = arith.addf %101, %102 : vector<4x32xf32>
    %104 = arith.truncf %103 : vector<4x32xf32> to vector<4x32xbf16>
    %cst_36 = arith.constant dense<0.000000e+00> : vector<4x96xf32>
    %105 = tpu.matmul %104, %0, %cst_36 {dimension_numbers = #tpu.dot_dimension_numbers<[1], [0], [0], [1], [0, 0, 1, 1], [], []>} : vector<4x32xbf16>, vector<32x96xbf16>, vector<4x96xf32> -> vector<4x96xf32>
    %106 = arith.addf %105, %5 : vector<4x96xf32>
    %107 = vector.extract_strided_slice %22 {offsets = [12, 0], sizes = [4, 96], strides = [1, 1]} : vector<32x96xf32> to vector<4x96xf32>
    %108 = vector.extract_strided_slice %107 {offsets = [0, 0], sizes = [4, 64], strides = [1, 1]} : vector<4x96xf32> to vector<4x64xf32>
    %109 = vector.extract_strided_slice %106 {offsets = [0, 0], sizes = [4, 64], strides = [1, 1]} : vector<4x96xf32> to vector<4x64xf32>
    %110 = arith.addf %108, %109 : vector<4x64xf32>
    %111 = arith.negf %110 : vector<4x64xf32>
    %112 = math.exp %111 : vector<4x64xf32>
    %cst_37 = arith.constant 1.000000e+00 : f32
    %113 = vector.broadcast %cst_37 : f32 to vector<4x64xf32>
    %114 = arith.addf %113, %112 : vector<4x64xf32>
    %115 = arith.divf %113, %114 : vector<4x64xf32>
    %116 = vector.extract_strided_slice %115 {offsets = [0, 0], sizes = [4, 32], strides = [1, 1]} : vector<4x64xf32> to vector<4x32xf32>
    %117 = vector.extract_strided_slice %115 {offsets = [0, 32], sizes = [4, 32], strides = [1, 1]} : vector<4x64xf32> to vector<4x32xf32>
    %118 = vector.extract_strided_slice %107 {offsets = [0, 64], sizes = [4, 32], strides = [1, 1]} : vector<4x96xf32> to vector<4x32xf32>
    %119 = vector.extract_strided_slice %106 {offsets = [0, 64], sizes = [4, 32], strides = [1, 1]} : vector<4x96xf32> to vector<4x32xf32>
    %120 = arith.mulf %116, %119 : vector<4x32xf32>
    %121 = arith.addf %118, %120 : vector<4x32xf32>
    %122 = math.tanh %121 : vector<4x32xf32>
    %cst_38 = arith.constant 1.000000e+00 : f32
    %123 = vector.broadcast %cst_38 : f32 to vector<4x32xf32>
    %124 = arith.subf %123, %117 : vector<4x32xf32>
    %125 = arith.mulf %124, %122 : vector<4x32xf32>
    %126 = arith.mulf %117, %103 : vector<4x32xf32>
    %127 = arith.addf %125, %126 : vector<4x32xf32>
    %128 = arith.truncf %127 : vector<4x32xf32> to vector<4x32xbf16>
    %cst_39 = arith.constant dense<0.000000e+00> : vector<4x96xf32>
    %129 = tpu.matmul %128, %0, %cst_39 {dimension_numbers = #tpu.dot_dimension_numbers<[1], [0], [0], [1], [0, 0, 1, 1], [], []>} : vector<4x32xbf16>, vector<32x96xbf16>, vector<4x96xf32> -> vector<4x96xf32>
    %130 = arith.addf %129, %5 : vector<4x96xf32>
    %131 = vector.extract_strided_slice %22 {offsets = [16, 0], sizes = [4, 96], strides = [1, 1]} : vector<32x96xf32> to vector<4x96xf32>
    %132 = vector.extract_strided_slice %131 {offsets = [0, 0], sizes = [4, 64], strides = [1, 1]} : vector<4x96xf32> to vector<4x64xf32>
    %133 = vector.extract_strided_slice %130 {offsets = [0, 0], sizes = [4, 64], strides = [1, 1]} : vector<4x96xf32> to vector<4x64xf32>
    %134 = arith.addf %132, %133 : vector<4x64xf32>
    %135 = arith.negf %134 : vector<4x64xf32>
    %136 = math.exp %135 : vector<4x64xf32>
    %cst_40 = arith.constant 1.000000e+00 : f32
    %137 = vector.broadcast %cst_40 : f32 to vector<4x64xf32>
    %138 = arith.addf %137, %136 : vector<4x64xf32>
    %139 = arith.divf %137, %138 : vector<4x64xf32>
    %140 = vector.extract_strided_slice %139 {offsets = [0, 0], sizes = [4, 32], strides = [1, 1]} : vector<4x64xf32> to vector<4x32xf32>
    %141 = vector.extract_strided_slice %139 {offsets = [0, 32], sizes = [4, 32], strides = [1, 1]} : vector<4x64xf32> to vector<4x32xf32>
    %142 = vector.extract_strided_slice %131 {offsets = [0, 64], sizes = [4, 32], strides = [1, 1]} : vector<4x96xf32> to vector<4x32xf32>
    %143 = vector.extract_strided_slice %130 {offsets = [0, 64], sizes = [4, 32], strides = [1, 1]} : vector<4x96xf32> to vector<4x32xf32>
    %144 = arith.mulf %140, %143 : vector<4x32xf32>
    %145 = arith.addf %142, %144 : vector<4x32xf32>
    %146 = math.tanh %145 : vector<4x32xf32>
    %cst_41 = arith.constant 1.000000e+00 : f32
    %147 = vector.broadcast %cst_41 : f32 to vector<4x32xf32>
    %148 = arith.subf %147, %141 : vector<4x32xf32>
    %149 = arith.mulf %148, %146 : vector<4x32xf32>
    %150 = arith.mulf %141, %127 : vector<4x32xf32>
    %151 = arith.addf %149, %150 : vector<4x32xf32>
    %152 = arith.truncf %151 : vector<4x32xf32> to vector<4x32xbf16>
    %cst_42 = arith.constant dense<0.000000e+00> : vector<4x96xf32>
    %153 = tpu.matmul %152, %0, %cst_42 {dimension_numbers = #tpu.dot_dimension_numbers<[1], [0], [0], [1], [0, 0, 1, 1], [], []>} : vector<4x32xbf16>, vector<32x96xbf16>, vector<4x96xf32> -> vector<4x96xf32>
    %154 = arith.addf %153, %5 : vector<4x96xf32>
    %155 = vector.extract_strided_slice %22 {offsets = [20, 0], sizes = [4, 96], strides = [1, 1]} : vector<32x96xf32> to vector<4x96xf32>
    %156 = vector.extract_strided_slice %155 {offsets = [0, 0], sizes = [4, 64], strides = [1, 1]} : vector<4x96xf32> to vector<4x64xf32>
    %157 = vector.extract_strided_slice %154 {offsets = [0, 0], sizes = [4, 64], strides = [1, 1]} : vector<4x96xf32> to vector<4x64xf32>
    %158 = arith.addf %156, %157 : vector<4x64xf32>
    %159 = arith.negf %158 : vector<4x64xf32>
    %160 = math.exp %159 : vector<4x64xf32>
    %cst_43 = arith.constant 1.000000e+00 : f32
    %161 = vector.broadcast %cst_43 : f32 to vector<4x64xf32>
    %162 = arith.addf %161, %160 : vector<4x64xf32>
    %163 = arith.divf %161, %162 : vector<4x64xf32>
    %164 = vector.extract_strided_slice %163 {offsets = [0, 0], sizes = [4, 32], strides = [1, 1]} : vector<4x64xf32> to vector<4x32xf32>
    %165 = vector.extract_strided_slice %163 {offsets = [0, 32], sizes = [4, 32], strides = [1, 1]} : vector<4x64xf32> to vector<4x32xf32>
    %166 = vector.extract_strided_slice %155 {offsets = [0, 64], sizes = [4, 32], strides = [1, 1]} : vector<4x96xf32> to vector<4x32xf32>
    %167 = vector.extract_strided_slice %154 {offsets = [0, 64], sizes = [4, 32], strides = [1, 1]} : vector<4x96xf32> to vector<4x32xf32>
    %168 = arith.mulf %164, %167 : vector<4x32xf32>
    %169 = arith.addf %166, %168 : vector<4x32xf32>
    %170 = math.tanh %169 : vector<4x32xf32>
    %cst_44 = arith.constant 1.000000e+00 : f32
    %171 = vector.broadcast %cst_44 : f32 to vector<4x32xf32>
    %172 = arith.subf %171, %165 : vector<4x32xf32>
    %173 = arith.mulf %172, %170 : vector<4x32xf32>
    %174 = arith.mulf %165, %151 : vector<4x32xf32>
    %175 = arith.addf %173, %174 : vector<4x32xf32>
    %176 = arith.truncf %175 : vector<4x32xf32> to vector<4x32xbf16>
    %cst_45 = arith.constant dense<0.000000e+00> : vector<4x96xf32>
    %177 = tpu.matmul %176, %0, %cst_45 {dimension_numbers = #tpu.dot_dimension_numbers<[1], [0], [0], [1], [0, 0, 1, 1], [], []>} : vector<4x32xbf16>, vector<32x96xbf16>, vector<4x96xf32> -> vector<4x96xf32>
    %178 = arith.addf %177, %5 : vector<4x96xf32>
    %179 = vector.extract_strided_slice %22 {offsets = [24, 0], sizes = [4, 96], strides = [1, 1]} : vector<32x96xf32> to vector<4x96xf32>
    %180 = vector.extract_strided_slice %179 {offsets = [0, 0], sizes = [4, 64], strides = [1, 1]} : vector<4x96xf32> to vector<4x64xf32>
    %181 = vector.extract_strided_slice %178 {offsets = [0, 0], sizes = [4, 64], strides = [1, 1]} : vector<4x96xf32> to vector<4x64xf32>
    %182 = arith.addf %180, %181 : vector<4x64xf32>
    %183 = arith.negf %182 : vector<4x64xf32>
    %184 = math.exp %183 : vector<4x64xf32>
    %cst_46 = arith.constant 1.000000e+00 : f32
    %185 = vector.broadcast %cst_46 : f32 to vector<4x64xf32>
    %186 = arith.addf %185, %184 : vector<4x64xf32>
    %187 = arith.divf %185, %186 : vector<4x64xf32>
    %188 = vector.extract_strided_slice %187 {offsets = [0, 0], sizes = [4, 32], strides = [1, 1]} : vector<4x64xf32> to vector<4x32xf32>
    %189 = vector.extract_strided_slice %187 {offsets = [0, 32], sizes = [4, 32], strides = [1, 1]} : vector<4x64xf32> to vector<4x32xf32>
    %190 = vector.extract_strided_slice %179 {offsets = [0, 64], sizes = [4, 32], strides = [1, 1]} : vector<4x96xf32> to vector<4x32xf32>
    %191 = vector.extract_strided_slice %178 {offsets = [0, 64], sizes = [4, 32], strides = [1, 1]} : vector<4x96xf32> to vector<4x32xf32>
    %192 = arith.mulf %188, %191 : vector<4x32xf32>
    %193 = arith.addf %190, %192 : vector<4x32xf32>
    %194 = math.tanh %193 : vector<4x32xf32>
    %cst_47 = arith.constant 1.000000e+00 : f32
    %195 = vector.broadcast %cst_47 : f32 to vector<4x32xf32>
    %196 = arith.subf %195, %189 : vector<4x32xf32>
    %197 = arith.mulf %196, %194 : vector<4x32xf32>
    %198 = arith.mulf %189, %175 : vector<4x32xf32>
    %199 = arith.addf %197, %198 : vector<4x32xf32>
    %200 = arith.truncf %199 : vector<4x32xf32> to vector<4x32xbf16>
    %cst_48 = arith.constant dense<0.000000e+00> : vector<4x96xf32>
    %201 = tpu.matmul %200, %0, %cst_48 {dimension_numbers = #tpu.dot_dimension_numbers<[1], [0], [0], [1], [0, 0, 1, 1], [], []>} : vector<4x32xbf16>, vector<32x96xbf16>, vector<4x96xf32> -> vector<4x96xf32>
    %202 = arith.addf %201, %5 : vector<4x96xf32>
    %203 = vector.extract_strided_slice %22 {offsets = [28, 0], sizes = [4, 96], strides = [1, 1]} : vector<32x96xf32> to vector<4x96xf32>
    %204 = vector.extract_strided_slice %203 {offsets = [0, 0], sizes = [4, 64], strides = [1, 1]} : vector<4x96xf32> to vector<4x64xf32>
    %205 = vector.extract_strided_slice %202 {offsets = [0, 0], sizes = [4, 64], strides = [1, 1]} : vector<4x96xf32> to vector<4x64xf32>
    %206 = arith.addf %204, %205 : vector<4x64xf32>
    %207 = arith.negf %206 : vector<4x64xf32>
    %208 = math.exp %207 : vector<4x64xf32>
    %cst_49 = arith.constant 1.000000e+00 : f32
    %209 = vector.broadcast %cst_49 : f32 to vector<4x64xf32>
    %210 = arith.addf %209, %208 : vector<4x64xf32>
    %211 = arith.divf %209, %210 : vector<4x64xf32>
    %212 = vector.extract_strided_slice %211 {offsets = [0, 0], sizes = [4, 32], strides = [1, 1]} : vector<4x64xf32> to vector<4x32xf32>
    %213 = vector.extract_strided_slice %211 {offsets = [0, 32], sizes = [4, 32], strides = [1, 1]} : vector<4x64xf32> to vector<4x32xf32>
    %214 = vector.extract_strided_slice %203 {offsets = [0, 64], sizes = [4, 32], strides = [1, 1]} : vector<4x96xf32> to vector<4x32xf32>
    %215 = vector.extract_strided_slice %202 {offsets = [0, 64], sizes = [4, 32], strides = [1, 1]} : vector<4x96xf32> to vector<4x32xf32>
    %216 = arith.mulf %212, %215 : vector<4x32xf32>
    %217 = arith.addf %214, %216 : vector<4x32xf32>
    %218 = math.tanh %217 : vector<4x32xf32>
    %cst_50 = arith.constant 1.000000e+00 : f32
    %219 = vector.broadcast %cst_50 : f32 to vector<4x32xf32>
    %220 = arith.subf %219, %213 : vector<4x32xf32>
    %221 = arith.mulf %220, %218 : vector<4x32xf32>
    %222 = arith.mulf %213, %199 : vector<4x32xf32>
    %223 = arith.addf %221, %222 : vector<4x32xf32>
    %224 = arith.truncf %223 : vector<4x32xf32> to vector<4x32xbf16>
    %cst_51 = arith.constant dense<0.000000e+00> : vector<4x192xf32>
    %225 = tpu.matmul %224, %1, %cst_51 {dimension_numbers = #tpu.dot_dimension_numbers<[1], [0], [0], [1], [0, 0, 1, 1], [], []>} : vector<4x32xbf16>, vector<32x192xbf16>, vector<4x192xf32> -> vector<4x192xf32>
    %226 = vector.extract_strided_slice %225 {offsets = [0, 0], sizes = [4, 96], strides = [1, 1]} : vector<4x192xf32> to vector<4x96xf32>
    %227 = arith.addf %226, %8 : vector<4x96xf32>
    %228 = vector.extract_strided_slice %30 {offsets = [0, 0], sizes = [4, 64], strides = [1, 1]} : vector<4x96xf32> to vector<4x64xf32>
    %229 = vector.extract_strided_slice %227 {offsets = [0, 0], sizes = [4, 64], strides = [1, 1]} : vector<4x96xf32> to vector<4x64xf32>
    %230 = arith.addf %228, %229 : vector<4x64xf32>
    %231 = arith.negf %230 : vector<4x64xf32>
    %232 = math.exp %231 : vector<4x64xf32>
    %cst_52 = arith.constant 1.000000e+00 : f32
    %233 = vector.broadcast %cst_52 : f32 to vector<4x64xf32>
    %234 = arith.addf %233, %232 : vector<4x64xf32>
    %235 = arith.divf %233, %234 : vector<4x64xf32>
    %236 = vector.extract_strided_slice %235 {offsets = [0, 0], sizes = [4, 32], strides = [1, 1]} : vector<4x64xf32> to vector<4x32xf32>
    %237 = vector.extract_strided_slice %235 {offsets = [0, 32], sizes = [4, 32], strides = [1, 1]} : vector<4x64xf32> to vector<4x32xf32>
    %238 = vector.extract_strided_slice %30 {offsets = [0, 64], sizes = [4, 32], strides = [1, 1]} : vector<4x96xf32> to vector<4x32xf32>
    %239 = vector.extract_strided_slice %227 {offsets = [0, 64], sizes = [4, 32], strides = [1, 1]} : vector<4x96xf32> to vector<4x32xf32>
    %240 = arith.mulf %236, %239 : vector<4x32xf32>
    %241 = arith.addf %238, %240 : vector<4x32xf32>
    %242 = math.tanh %241 : vector<4x32xf32>
    %cst_53 = arith.constant 1.000000e+00 : f32
    %243 = vector.broadcast %cst_53 : f32 to vector<4x32xf32>
    %244 = arith.subf %243, %237 : vector<4x32xf32>
    %245 = arith.mulf %244, %242 : vector<4x32xf32>
    %246 = arith.mulf %237, %223 : vector<4x32xf32>
    %247 = arith.addf %245, %246 : vector<4x32xf32>
    %248 = arith.truncf %247 : vector<4x32xf32> to vector<4x32xbf16>
    %cst_54 = arith.constant dense<0.000000e+00> : vector<4x192xf32>
    %249 = tpu.matmul %248, %1, %cst_54 {dimension_numbers = #tpu.dot_dimension_numbers<[1], [0], [0], [1], [0, 0, 1, 1], [], []>} : vector<4x32xbf16>, vector<32x192xbf16>, vector<4x192xf32> -> vector<4x192xf32>
    %250 = vector.extract_strided_slice %249 {offsets = [0, 0], sizes = [4, 96], strides = [1, 1]} : vector<4x192xf32> to vector<4x96xf32>
    %251 = arith.addf %250, %8 : vector<4x96xf32>
    %252 = vector.extract_strided_slice %249 {offsets = [0, 96], sizes = [4, 96], strides = [1, 1]} : vector<4x192xf32> to vector<4x96xf32>
    %253 = arith.addf %30, %252 : vector<4x96xf32>
    %254 = arith.addf %253, %11 : vector<4x96xf32>
    %255 = arith.truncf %247 : vector<4x32xf32> to vector<4x32xbf16>
    %cst_55 = arith.constant dense<0.000000e+00> : vector<4x16xf32>
    %256 = tpu.matmul %255, %2, %cst_55 {dimension_numbers = #tpu.dot_dimension_numbers<[1], [0], [0], [1], [0, 0, 1, 1], [], []>} : vector<4x32xbf16>, vector<32x16xbf16>, vector<4x16xf32> -> vector<4x16xf32>
    %257 = arith.addf %256, %14 : vector<4x16xf32>
    %258 = arith.addf %257, %23 : vector<4x16xf32>
    %c0_56 = arith.constant 0 : index
    %c0_57 = arith.constant 0 : index
    %259 = vector.load %arg13[%c0_56, %c0_57] : memref<4x128xf32, #tpu.memory_space<vmem>>, vector<4x16xf32>
    tpu.vector_store %arg13[%c0_56, %c0_57], %258 {strides = array<i32>} : memref<4x128xf32, #tpu.memory_space<vmem>>, vector<4x16xf32>,
    %260 = vector.extract_strided_slice %254 {offsets = [0, 0], sizes = [4, 64], strides = [1, 1]} : vector<4x96xf32> to vector<4x64xf32>
    %261 = vector.extract_strided_slice %251 {offsets = [0, 0], sizes = [4, 64], strides = [1, 1]} : vector<4x96xf32> to vector<4x64xf32>
    %262 = arith.addf %260, %261 : vector<4x64xf32>
    %263 = arith.negf %262 : vector<4x64xf32>
    %264 = math.exp %263 : vector<4x64xf32>
    %cst_58 = arith.constant 1.000000e+00 : f32
    %265 = vector.broadcast %cst_58 : f32 to vector<4x64xf32>
    %266 = arith.addf %265, %264 : vector<4x64xf32>
    %267 = arith.divf %265, %266 : vector<4x64xf32>
    %268 = vector.extract_strided_slice %267 {offsets = [0, 0], sizes = [4, 32], strides = [1, 1]} : vector<4x64xf32> to vector<4x32xf32>
    %269 = vector.extract_strided_slice %267 {offsets = [0, 32], sizes = [4, 32], strides = [1, 1]} : vector<4x64xf32> to vector<4x32xf32>
    %270 = vector.extract_strided_slice %254 {offsets = [0, 64], sizes = [4, 32], strides = [1, 1]} : vector<4x96xf32> to vector<4x32xf32>
    %271 = vector.extract_strided_slice %251 {offsets = [0, 64], sizes = [4, 32], strides = [1, 1]} : vector<4x96xf32> to vector<4x32xf32>
    %272 = arith.mulf %268, %271 : vector<4x32xf32>
    %273 = arith.addf %270, %272 : vector<4x32xf32>
    %274 = math.tanh %273 : vector<4x32xf32>
    %cst_59 = arith.constant 1.000000e+00 : f32
    %275 = vector.broadcast %cst_59 : f32 to vector<4x32xf32>
    %276 = arith.subf %275, %269 : vector<4x32xf32>
    %277 = arith.mulf %276, %274 : vector<4x32xf32>
    %278 = arith.mulf %269, %247 : vector<4x32xf32>
    %279 = arith.addf %277, %278 : vector<4x32xf32>
    %280 = arith.truncf %279 : vector<4x32xf32> to vector<4x32xbf16>
    %cst_60 = arith.constant dense<0.000000e+00> : vector<4x192xf32>
    %281 = tpu.matmul %280, %1, %cst_60 {dimension_numbers = #tpu.dot_dimension_numbers<[1], [0], [0], [1], [0, 0, 1, 1], [], []>} : vector<4x32xbf16>, vector<32x192xbf16>, vector<4x192xf32> -> vector<4x192xf32>
    %282 = vector.extract_strided_slice %281 {offsets = [0, 0], sizes = [4, 96], strides = [1, 1]} : vector<4x192xf32> to vector<4x96xf32>
    %283 = arith.addf %282, %8 : vector<4x96xf32>
    %284 = vector.extract_strided_slice %281 {offsets = [0, 96], sizes = [4, 96], strides = [1, 1]} : vector<4x192xf32> to vector<4x96xf32>
    %285 = arith.addf %254, %284 : vector<4x96xf32>
    %286 = arith.addf %285, %11 : vector<4x96xf32>
    %287 = arith.truncf %279 : vector<4x32xf32> to vector<4x32xbf16>
    %cst_61 = arith.constant dense<0.000000e+00> : vector<4x16xf32>
    %288 = tpu.matmul %287, %2, %cst_61 {dimension_numbers = #tpu.dot_dimension_numbers<[1], [0], [0], [1], [0, 0, 1, 1], [], []>} : vector<4x32xbf16>, vector<32x16xbf16>, vector<4x16xf32> -> vector<4x16xf32>
    %289 = arith.addf %288, %14 : vector<4x16xf32>
    %290 = arith.addf %289, %258 : vector<4x16xf32>
    %c0_62 = arith.constant 0 : index
    %c16 = arith.constant 16 : index
    %291 = vector.load %arg13[%c0_62, %c16] : memref<4x128xf32, #tpu.memory_space<vmem>>, vector<4x16xf32>
    tpu.vector_store %arg13[%c0_62, %c16], %290 {strides = array<i32>} : memref<4x128xf32, #tpu.memory_space<vmem>>, vector<4x16xf32>,
    %292 = vector.extract_strided_slice %286 {offsets = [0, 0], sizes = [4, 64], strides = [1, 1]} : vector<4x96xf32> to vector<4x64xf32>
    %293 = vector.extract_strided_slice %283 {offsets = [0, 0], sizes = [4, 64], strides = [1, 1]} : vector<4x96xf32> to vector<4x64xf32>
    %294 = arith.addf %292, %293 : vector<4x64xf32>
    %295 = arith.negf %294 : vector<4x64xf32>
    %296 = math.exp %295 : vector<4x64xf32>
    %cst_63 = arith.constant 1.000000e+00 : f32
    %297 = vector.broadcast %cst_63 : f32 to vector<4x64xf32>
    %298 = arith.addf %297, %296 : vector<4x64xf32>
    %299 = arith.divf %297, %298 : vector<4x64xf32>
    %300 = vector.extract_strided_slice %299 {offsets = [0, 0], sizes = [4, 32], strides = [1, 1]} : vector<4x64xf32> to vector<4x32xf32>
    %301 = vector.extract_strided_slice %299 {offsets = [0, 32], sizes = [4, 32], strides = [1, 1]} : vector<4x64xf32> to vector<4x32xf32>
    %302 = vector.extract_strided_slice %286 {offsets = [0, 64], sizes = [4, 32], strides = [1, 1]} : vector<4x96xf32> to vector<4x32xf32>
    %303 = vector.extract_strided_slice %283 {offsets = [0, 64], sizes = [4, 32], strides = [1, 1]} : vector<4x96xf32> to vector<4x32xf32>
    %304 = arith.mulf %300, %303 : vector<4x32xf32>
    %305 = arith.addf %302, %304 : vector<4x32xf32>
    %306 = math.tanh %305 : vector<4x32xf32>
    %cst_64 = arith.constant 1.000000e+00 : f32
    %307 = vector.broadcast %cst_64 : f32 to vector<4x32xf32>
    %308 = arith.subf %307, %301 : vector<4x32xf32>
    %309 = arith.mulf %308, %306 : vector<4x32xf32>
    %310 = arith.mulf %301, %279 : vector<4x32xf32>
    %311 = arith.addf %309, %310 : vector<4x32xf32>
    %312 = arith.truncf %311 : vector<4x32xf32> to vector<4x32xbf16>
    %cst_65 = arith.constant dense<0.000000e+00> : vector<4x192xf32>
    %313 = tpu.matmul %312, %1, %cst_65 {dimension_numbers = #tpu.dot_dimension_numbers<[1], [0], [0], [1], [0, 0, 1, 1], [], []>} : vector<4x32xbf16>, vector<32x192xbf16>, vector<4x192xf32> -> vector<4x192xf32>
    %314 = vector.extract_strided_slice %313 {offsets = [0, 0], sizes = [4, 96], strides = [1, 1]} : vector<4x192xf32> to vector<4x96xf32>
    %315 = arith.addf %314, %8 : vector<4x96xf32>
    %316 = vector.extract_strided_slice %313 {offsets = [0, 96], sizes = [4, 96], strides = [1, 1]} : vector<4x192xf32> to vector<4x96xf32>
    %317 = arith.addf %286, %316 : vector<4x96xf32>
    %318 = arith.addf %317, %11 : vector<4x96xf32>
    %319 = arith.truncf %311 : vector<4x32xf32> to vector<4x32xbf16>
    %cst_66 = arith.constant dense<0.000000e+00> : vector<4x16xf32>
    %320 = tpu.matmul %319, %2, %cst_66 {dimension_numbers = #tpu.dot_dimension_numbers<[1], [0], [0], [1], [0, 0, 1, 1], [], []>} : vector<4x32xbf16>, vector<32x16xbf16>, vector<4x16xf32> -> vector<4x16xf32>
    %321 = arith.addf %320, %14 : vector<4x16xf32>
    %322 = arith.addf %321, %290 : vector<4x16xf32>
    %c0_67 = arith.constant 0 : index
    %c32 = arith.constant 32 : index
    %323 = vector.load %arg13[%c0_67, %c32] : memref<4x128xf32, #tpu.memory_space<vmem>>, vector<4x16xf32>
    tpu.vector_store %arg13[%c0_67, %c32], %322 {strides = array<i32>} : memref<4x128xf32, #tpu.memory_space<vmem>>, vector<4x16xf32>,
    %324 = vector.extract_strided_slice %318 {offsets = [0, 0], sizes = [4, 64], strides = [1, 1]} : vector<4x96xf32> to vector<4x64xf32>
    %325 = vector.extract_strided_slice %315 {offsets = [0, 0], sizes = [4, 64], strides = [1, 1]} : vector<4x96xf32> to vector<4x64xf32>
    %326 = arith.addf %324, %325 : vector<4x64xf32>
    %327 = arith.negf %326 : vector<4x64xf32>
    %328 = math.exp %327 : vector<4x64xf32>
    %cst_68 = arith.constant 1.000000e+00 : f32
    %329 = vector.broadcast %cst_68 : f32 to vector<4x64xf32>
    %330 = arith.addf %329, %328 : vector<4x64xf32>
    %331 = arith.divf %329, %330 : vector<4x64xf32>
    %332 = vector.extract_strided_slice %331 {offsets = [0, 0], sizes = [4, 32], strides = [1, 1]} : vector<4x64xf32> to vector<4x32xf32>
    %333 = vector.extract_strided_slice %331 {offsets = [0, 32], sizes = [4, 32], strides = [1, 1]} : vector<4x64xf32> to vector<4x32xf32>
    %334 = vector.extract_strided_slice %318 {offsets = [0, 64], sizes = [4, 32], strides = [1, 1]} : vector<4x96xf32> to vector<4x32xf32>
    %335 = vector.extract_strided_slice %315 {offsets = [0, 64], sizes = [4, 32], strides = [1, 1]} : vector<4x96xf32> to vector<4x32xf32>
    %336 = arith.mulf %332, %335 : vector<4x32xf32>
    %337 = arith.addf %334, %336 : vector<4x32xf32>
    %338 = math.tanh %337 : vector<4x32xf32>
    %cst_69 = arith.constant 1.000000e+00 : f32
    %339 = vector.broadcast %cst_69 : f32 to vector<4x32xf32>
    %340 = arith.subf %339, %333 : vector<4x32xf32>
    %341 = arith.mulf %340, %338 : vector<4x32xf32>
    %342 = arith.mulf %333, %311 : vector<4x32xf32>
    %343 = arith.addf %341, %342 : vector<4x32xf32>
    %344 = arith.truncf %343 : vector<4x32xf32> to vector<4x32xbf16>
    %cst_70 = arith.constant dense<0.000000e+00> : vector<4x192xf32>
    %345 = tpu.matmul %344, %1, %cst_70 {dimension_numbers = #tpu.dot_dimension_numbers<[1], [0], [0], [1], [0, 0, 1, 1], [], []>} : vector<4x32xbf16>, vector<32x192xbf16>, vector<4x192xf32> -> vector<4x192xf32>
    %346 = vector.extract_strided_slice %345 {offsets = [0, 0], sizes = [4, 96], strides = [1, 1]} : vector<4x192xf32> to vector<4x96xf32>
    %347 = arith.addf %346, %8 : vector<4x96xf32>
    %348 = vector.extract_strided_slice %345 {offsets = [0, 96], sizes = [4, 96], strides = [1, 1]} : vector<4x192xf32> to vector<4x96xf32>
    %349 = arith.addf %318, %348 : vector<4x96xf32>
    %350 = arith.addf %349, %11 : vector<4x96xf32>
    %351 = arith.truncf %343 : vector<4x32xf32> to vector<4x32xbf16>
    %cst_71 = arith.constant dense<0.000000e+00> : vector<4x16xf32>
    %352 = tpu.matmul %351, %2, %cst_71 {dimension_numbers = #tpu.dot_dimension_numbers<[1], [0], [0], [1], [0, 0, 1, 1], [], []>} : vector<4x32xbf16>, vector<32x16xbf16>, vector<4x16xf32> -> vector<4x16xf32>
    %353 = arith.addf %352, %14 : vector<4x16xf32>
    %354 = arith.addf %353, %322 : vector<4x16xf32>
    %c0_72 = arith.constant 0 : index
    %c48 = arith.constant 48 : index
    %355 = vector.load %arg13[%c0_72, %c48] : memref<4x128xf32, #tpu.memory_space<vmem>>, vector<4x16xf32>
    tpu.vector_store %arg13[%c0_72, %c48], %354 {strides = array<i32>} : memref<4x128xf32, #tpu.memory_space<vmem>>, vector<4x16xf32>,
    %356 = vector.extract_strided_slice %350 {offsets = [0, 0], sizes = [4, 64], strides = [1, 1]} : vector<4x96xf32> to vector<4x64xf32>
    %357 = vector.extract_strided_slice %347 {offsets = [0, 0], sizes = [4, 64], strides = [1, 1]} : vector<4x96xf32> to vector<4x64xf32>
    %358 = arith.addf %356, %357 : vector<4x64xf32>
    %359 = arith.negf %358 : vector<4x64xf32>
    %360 = math.exp %359 : vector<4x64xf32>
    %cst_73 = arith.constant 1.000000e+00 : f32
    %361 = vector.broadcast %cst_73 : f32 to vector<4x64xf32>
    %362 = arith.addf %361, %360 : vector<4x64xf32>
    %363 = arith.divf %361, %362 : vector<4x64xf32>
    %364 = vector.extract_strided_slice %363 {offsets = [0, 0], sizes = [4, 32], strides = [1, 1]} : vector<4x64xf32> to vector<4x32xf32>
    %365 = vector.extract_strided_slice %363 {offsets = [0, 32], sizes = [4, 32], strides = [1, 1]} : vector<4x64xf32> to vector<4x32xf32>
    %366 = vector.extract_strided_slice %350 {offsets = [0, 64], sizes = [4, 32], strides = [1, 1]} : vector<4x96xf32> to vector<4x32xf32>
    %367 = vector.extract_strided_slice %347 {offsets = [0, 64], sizes = [4, 32], strides = [1, 1]} : vector<4x96xf32> to vector<4x32xf32>
    %368 = arith.mulf %364, %367 : vector<4x32xf32>
    %369 = arith.addf %366, %368 : vector<4x32xf32>
    %370 = math.tanh %369 : vector<4x32xf32>
    %cst_74 = arith.constant 1.000000e+00 : f32
    %371 = vector.broadcast %cst_74 : f32 to vector<4x32xf32>
    %372 = arith.subf %371, %365 : vector<4x32xf32>
    %373 = arith.mulf %372, %370 : vector<4x32xf32>
    %374 = arith.mulf %365, %343 : vector<4x32xf32>
    %375 = arith.addf %373, %374 : vector<4x32xf32>
    %376 = arith.truncf %375 : vector<4x32xf32> to vector<4x32xbf16>
    %cst_75 = arith.constant dense<0.000000e+00> : vector<4x192xf32>
    %377 = tpu.matmul %376, %1, %cst_75 {dimension_numbers = #tpu.dot_dimension_numbers<[1], [0], [0], [1], [0, 0, 1, 1], [], []>} : vector<4x32xbf16>, vector<32x192xbf16>, vector<4x192xf32> -> vector<4x192xf32>
    %378 = vector.extract_strided_slice %377 {offsets = [0, 0], sizes = [4, 96], strides = [1, 1]} : vector<4x192xf32> to vector<4x96xf32>
    %379 = arith.addf %378, %8 : vector<4x96xf32>
    %380 = vector.extract_strided_slice %377 {offsets = [0, 96], sizes = [4, 96], strides = [1, 1]} : vector<4x192xf32> to vector<4x96xf32>
    %381 = arith.addf %350, %380 : vector<4x96xf32>
    %382 = arith.addf %381, %11 : vector<4x96xf32>
    %383 = arith.truncf %375 : vector<4x32xf32> to vector<4x32xbf16>
    %cst_76 = arith.constant dense<0.000000e+00> : vector<4x16xf32>
    %384 = tpu.matmul %383, %2, %cst_76 {dimension_numbers = #tpu.dot_dimension_numbers<[1], [0], [0], [1], [0, 0, 1, 1], [], []>} : vector<4x32xbf16>, vector<32x16xbf16>, vector<4x16xf32> -> vector<4x16xf32>
    %385 = arith.addf %384, %14 : vector<4x16xf32>
    %386 = arith.addf %385, %354 : vector<4x16xf32>
    %c0_77 = arith.constant 0 : index
    %c64 = arith.constant 64 : index
    %387 = vector.load %arg13[%c0_77, %c64] : memref<4x128xf32, #tpu.memory_space<vmem>>, vector<4x16xf32>
    tpu.vector_store %arg13[%c0_77, %c64], %386 {strides = array<i32>} : memref<4x128xf32, #tpu.memory_space<vmem>>, vector<4x16xf32>,
    %388 = vector.extract_strided_slice %382 {offsets = [0, 0], sizes = [4, 64], strides = [1, 1]} : vector<4x96xf32> to vector<4x64xf32>
    %389 = vector.extract_strided_slice %379 {offsets = [0, 0], sizes = [4, 64], strides = [1, 1]} : vector<4x96xf32> to vector<4x64xf32>
    %390 = arith.addf %388, %389 : vector<4x64xf32>
    %391 = arith.negf %390 : vector<4x64xf32>
    %392 = math.exp %391 : vector<4x64xf32>
    %cst_78 = arith.constant 1.000000e+00 : f32
    %393 = vector.broadcast %cst_78 : f32 to vector<4x64xf32>
    %394 = arith.addf %393, %392 : vector<4x64xf32>
    %395 = arith.divf %393, %394 : vector<4x64xf32>
    %396 = vector.extract_strided_slice %395 {offsets = [0, 0], sizes = [4, 32], strides = [1, 1]} : vector<4x64xf32> to vector<4x32xf32>
    %397 = vector.extract_strided_slice %395 {offsets = [0, 32], sizes = [4, 32], strides = [1, 1]} : vector<4x64xf32> to vector<4x32xf32>
    %398 = vector.extract_strided_slice %382 {offsets = [0, 64], sizes = [4, 32], strides = [1, 1]} : vector<4x96xf32> to vector<4x32xf32>
    %399 = vector.extract_strided_slice %379 {offsets = [0, 64], sizes = [4, 32], strides = [1, 1]} : vector<4x96xf32> to vector<4x32xf32>
    %400 = arith.mulf %396, %399 : vector<4x32xf32>
    %401 = arith.addf %398, %400 : vector<4x32xf32>
    %402 = math.tanh %401 : vector<4x32xf32>
    %cst_79 = arith.constant 1.000000e+00 : f32
    %403 = vector.broadcast %cst_79 : f32 to vector<4x32xf32>
    %404 = arith.subf %403, %397 : vector<4x32xf32>
    %405 = arith.mulf %404, %402 : vector<4x32xf32>
    %406 = arith.mulf %397, %375 : vector<4x32xf32>
    %407 = arith.addf %405, %406 : vector<4x32xf32>
    %408 = arith.truncf %407 : vector<4x32xf32> to vector<4x32xbf16>
    %cst_80 = arith.constant dense<0.000000e+00> : vector<4x192xf32>
    %409 = tpu.matmul %408, %1, %cst_80 {dimension_numbers = #tpu.dot_dimension_numbers<[1], [0], [0], [1], [0, 0, 1, 1], [], []>} : vector<4x32xbf16>, vector<32x192xbf16>, vector<4x192xf32> -> vector<4x192xf32>
    %410 = vector.extract_strided_slice %409 {offsets = [0, 0], sizes = [4, 96], strides = [1, 1]} : vector<4x192xf32> to vector<4x96xf32>
    %411 = arith.addf %410, %8 : vector<4x96xf32>
    %412 = vector.extract_strided_slice %409 {offsets = [0, 96], sizes = [4, 96], strides = [1, 1]} : vector<4x192xf32> to vector<4x96xf32>
    %413 = arith.addf %382, %412 : vector<4x96xf32>
    %414 = arith.addf %413, %11 : vector<4x96xf32>
    %415 = arith.truncf %407 : vector<4x32xf32> to vector<4x32xbf16>
    %cst_81 = arith.constant dense<0.000000e+00> : vector<4x16xf32>
    %416 = tpu.matmul %415, %2, %cst_81 {dimension_numbers = #tpu.dot_dimension_numbers<[1], [0], [0], [1], [0, 0, 1, 1], [], []>} : vector<4x32xbf16>, vector<32x16xbf16>, vector<4x16xf32> -> vector<4x16xf32>
    %417 = arith.addf %416, %14 : vector<4x16xf32>
    %418 = arith.addf %417, %386 : vector<4x16xf32>
    %c0_82 = arith.constant 0 : index
    %c80 = arith.constant 80 : index
    %419 = vector.load %arg13[%c0_82, %c80] : memref<4x128xf32, #tpu.memory_space<vmem>>, vector<4x16xf32>
    tpu.vector_store %arg13[%c0_82, %c80], %418 {strides = array<i32>} : memref<4x128xf32, #tpu.memory_space<vmem>>, vector<4x16xf32>,
    %420 = vector.extract_strided_slice %414 {offsets = [0, 0], sizes = [4, 64], strides = [1, 1]} : vector<4x96xf32> to vector<4x64xf32>
    %421 = vector.extract_strided_slice %411 {offsets = [0, 0], sizes = [4, 64], strides = [1, 1]} : vector<4x96xf32> to vector<4x64xf32>
    %422 = arith.addf %420, %421 : vector<4x64xf32>
    %423 = arith.negf %422 : vector<4x64xf32>
    %424 = math.exp %423 : vector<4x64xf32>
    %cst_83 = arith.constant 1.000000e+00 : f32
    %425 = vector.broadcast %cst_83 : f32 to vector<4x64xf32>
    %426 = arith.addf %425, %424 : vector<4x64xf32>
    %427 = arith.divf %425, %426 : vector<4x64xf32>
    %428 = vector.extract_strided_slice %427 {offsets = [0, 0], sizes = [4, 32], strides = [1, 1]} : vector<4x64xf32> to vector<4x32xf32>
    %429 = vector.extract_strided_slice %427 {offsets = [0, 32], sizes = [4, 32], strides = [1, 1]} : vector<4x64xf32> to vector<4x32xf32>
    %430 = vector.extract_strided_slice %414 {offsets = [0, 64], sizes = [4, 32], strides = [1, 1]} : vector<4x96xf32> to vector<4x32xf32>
    %431 = vector.extract_strided_slice %411 {offsets = [0, 64], sizes = [4, 32], strides = [1, 1]} : vector<4x96xf32> to vector<4x32xf32>
    %432 = arith.mulf %428, %431 : vector<4x32xf32>
    %433 = arith.addf %430, %432 : vector<4x32xf32>
    %434 = math.tanh %433 : vector<4x32xf32>
    %cst_84 = arith.constant 1.000000e+00 : f32
    %435 = vector.broadcast %cst_84 : f32 to vector<4x32xf32>
    %436 = arith.subf %435, %429 : vector<4x32xf32>
    %437 = arith.mulf %436, %434 : vector<4x32xf32>
    %438 = arith.mulf %429, %407 : vector<4x32xf32>
    %439 = arith.addf %437, %438 : vector<4x32xf32>
    %440 = arith.truncf %439 : vector<4x32xf32> to vector<4x32xbf16>
    %cst_85 = arith.constant dense<0.000000e+00> : vector<4x192xf32>
    %441 = tpu.matmul %440, %1, %cst_85 {dimension_numbers = #tpu.dot_dimension_numbers<[1], [0], [0], [1], [0, 0, 1, 1], [], []>} : vector<4x32xbf16>, vector<32x192xbf16>, vector<4x192xf32> -> vector<4x192xf32>
    %442 = vector.extract_strided_slice %441 {offsets = [0, 0], sizes = [4, 96], strides = [1, 1]} : vector<4x192xf32> to vector<4x96xf32>
    %443 = arith.addf %442, %8 : vector<4x96xf32>
    %444 = vector.extract_strided_slice %441 {offsets = [0, 96], sizes = [4, 96], strides = [1, 1]} : vector<4x192xf32> to vector<4x96xf32>
    %445 = arith.addf %414, %444 : vector<4x96xf32>
    %446 = arith.addf %445, %11 : vector<4x96xf32>
    %447 = arith.truncf %439 : vector<4x32xf32> to vector<4x32xbf16>
    %cst_86 = arith.constant dense<0.000000e+00> : vector<4x16xf32>
    %448 = tpu.matmul %447, %2, %cst_86 {dimension_numbers = #tpu.dot_dimension_numbers<[1], [0], [0], [1], [0, 0, 1, 1], [], []>} : vector<4x32xbf16>, vector<32x16xbf16>, vector<4x16xf32> -> vector<4x16xf32>
    %449 = arith.addf %448, %14 : vector<4x16xf32>
    %450 = arith.addf %449, %418 : vector<4x16xf32>
    %c0_87 = arith.constant 0 : index
    %c96 = arith.constant 96 : index
    %451 = vector.load %arg13[%c0_87, %c96] : memref<4x128xf32, #tpu.memory_space<vmem>>, vector<4x16xf32>
    tpu.vector_store %arg13[%c0_87, %c96], %450 {strides = array<i32>} : memref<4x128xf32, #tpu.memory_space<vmem>>, vector<4x16xf32>,
    %452 = vector.extract_strided_slice %446 {offsets = [0, 0], sizes = [4, 64], strides = [1, 1]} : vector<4x96xf32> to vector<4x64xf32>
    %453 = vector.extract_strided_slice %443 {offsets = [0, 0], sizes = [4, 64], strides = [1, 1]} : vector<4x96xf32> to vector<4x64xf32>
    %454 = arith.addf %452, %453 : vector<4x64xf32>
    %455 = arith.negf %454 : vector<4x64xf32>
    %456 = math.exp %455 : vector<4x64xf32>
    %cst_88 = arith.constant 1.000000e+00 : f32
    %457 = vector.broadcast %cst_88 : f32 to vector<4x64xf32>
    %458 = arith.addf %457, %456 : vector<4x64xf32>
    %459 = arith.divf %457, %458 : vector<4x64xf32>
    %460 = vector.extract_strided_slice %459 {offsets = [0, 0], sizes = [4, 32], strides = [1, 1]} : vector<4x64xf32> to vector<4x32xf32>
    %461 = vector.extract_strided_slice %459 {offsets = [0, 32], sizes = [4, 32], strides = [1, 1]} : vector<4x64xf32> to vector<4x32xf32>
    %462 = vector.extract_strided_slice %446 {offsets = [0, 64], sizes = [4, 32], strides = [1, 1]} : vector<4x96xf32> to vector<4x32xf32>
    %463 = vector.extract_strided_slice %443 {offsets = [0, 64], sizes = [4, 32], strides = [1, 1]} : vector<4x96xf32> to vector<4x32xf32>
    %464 = arith.mulf %460, %463 : vector<4x32xf32>
    %465 = arith.addf %462, %464 : vector<4x32xf32>
    %466 = math.tanh %465 : vector<4x32xf32>
    %cst_89 = arith.constant 1.000000e+00 : f32
    %467 = vector.broadcast %cst_89 : f32 to vector<4x32xf32>
    %468 = arith.subf %467, %461 : vector<4x32xf32>
    %469 = arith.mulf %468, %466 : vector<4x32xf32>
    %470 = arith.mulf %461, %439 : vector<4x32xf32>
    %471 = arith.addf %469, %470 : vector<4x32xf32>
    %472 = arith.truncf %471 : vector<4x32xf32> to vector<4x32xbf16>
    %cst_90 = arith.constant dense<0.000000e+00> : vector<4x16xf32>
    %473 = tpu.matmul %472, %2, %cst_90 {dimension_numbers = #tpu.dot_dimension_numbers<[1], [0], [0], [1], [0, 0, 1, 1], [], []>} : vector<4x32xbf16>, vector<32x16xbf16>, vector<4x16xf32> -> vector<4x16xf32>
    %474 = arith.addf %473, %14 : vector<4x16xf32>
    %475 = arith.addf %474, %450 : vector<4x16xf32>
    %c0_91 = arith.constant 0 : index
    %c112 = arith.constant 112 : index
    %476 = vector.load %arg13[%c0_91, %c112] : memref<4x128xf32, #tpu.memory_space<vmem>>, vector<4x16xf32>
    tpu.vector_store %arg13[%c0_91, %c112], %475 {strides = array<i32>} : memref<4x128xf32, #tpu.memory_space<vmem>>, vector<4x16xf32>,
    %c0_92 = arith.constant 0 : index
    %c0_93 = arith.constant 0 : index
    %477 = vector.load %arg14[%c0_92, %c0_93] : memref<4x32xf32, #tpu.memory_space<vmem>>, vector<4x32xf32>
    tpu.vector_store %arg14[%c0_92, %c0_93], %471 {strides = array<i32>} : memref<4x32xf32, #tpu.memory_space<vmem>>, vector<4x32xf32>,
    return
  }
}

</mosaic_0001>

<bundles_post_ra>
// kernel: seq2seq_cvae_forward.1
= control target key start
LH: loop header
LB: loop body
LE: loop exit
PB: predicated region body
PF: predicated region fallthrough
CT: control target
= control target key end

     0   :  { %vm94_vm0 = vcmask 130048   ;;  %s2272_s0 = inlined_call_operand.vmem [shape: f32[32,16], index: 0, kind: input, shape index: {}]   ;;  %s2273_s1 = inlined_call_operand.vmem [shape: f32[4,16], index: 1, kind: input, shape index: {}]   ;;  %s2274_s2 = inlined_call_operand.vmem [shape: bf16[16,96], index: 2, kind: input, shape index: {}]   ;;  %s2275_s3 = inlined_call_operand.vmem [shape: f32[1,96], index: 3, kind: input, shape index: {}]   ;;  %s2276_s4 = inlined_call_operand.vmem [shape: bf16[32,96], index: 4, kind: input, shape index: {}]   ;;  %s2277_s5 = inlined_call_operand.vmem [shape: f32[1,96], index: 5, kind: input, shape index: {}]   ;;  %s2278_s6 = inlined_call_operand.vmem [shape: bf16[16,96], index: 6, kind: input, shape index: {}]   ;;  %s2279_s7 = inlined_call_operand.vmem [shape: f32[1,96], index: 7, kind: input, shape index: {}]   ;;  %s2280_s8 = inlined_call_operand.vmem [shape: bf16[32,192], index: 8, kind: input, shape index: {}]   ;;  %s2281_s9 = inlined_call_operand.vmem [shape: f32[1,96], index: 9, kind: input, shape index: {}]   ;;  %s2282_s10 = inlined_call_operand.vmem [shape: f32[1,96], index: 10, kind: input, shape index: {}]   ;;  %s2283_s11 = inlined_call_operand.vmem [shape: bf16[32,16], index: 11, kind: input, shape index: {}]   ;;  %s2284_s12 = inlined_call_operand.vmem [shape: f32[1,16], index: 12, kind: input, shape index: {}]   ;;  %s2285_s13 = inlined_call_operand.vmem [shape: f32[4,128], index: 13, kind: output, shape index: {0}]   ;;  %s2286_s14 = inlined_call_operand.hbm [shape: f32[4,32], index: 14, kind: output, shape index: {1}]  }
   0x1   :  { %v1852_v0 = vld [vmem:[%s2276_s4 + $0x8] sm:$0xff]  ;;  %v1626_v1 = vld [vmem:[%s2274_s2] sm:$0xff] }
   0x2   :  { %v76_v2 = vld [vmem:[%s2272_s0] sm:$0xff]  ;;  %v77_v3 = vld [vmem:[%s2272_s0 + $0x8] sm:$0xff]  ;;  %172 = vmatpush.bf16.msra.mxu2 %v1852_v0  ;;  %108 = vmatpush.bf16.msra.mxu0 %v1626_v1 }
   0x3   :  { %v1867_v4 = vld [vmem:[%s2276_s4] sm:$0xff]  ;;  %v80_v5 = vpack.c.bf16 %v77_v3, %v76_v2  ;;  %231 = vmatpush.bf16.msra.mxu3 %v1852_v0 }
   0x6   :  { %485 = vmatpush.bf16.msrb.mxu0 %v1852_v0 }
   0x7   :  { %20 = vsyncpa [#allocation3], 0  ;;  %1533 = vmatmul.msk.bf16.vlgmr.msra.gmra.mxu0 %vm94_vm0, %v80_v5  ;;  %173 = vmatpush.bf16.msra.mxu2 %v1867_v4  ;;  %v1765_v6 = vmov 0   ;;  %v1884_v7 = vld [vmem:[%s2277_s5] ss:$0 sm:$0xff]  ;;  %s1766_s23 = smov 64  }
   0x8   :  { %232 = vmatpush.bf16.msra.mxu3 %v1867_v4  ;;  %v1891_v11 = vld [vmem:[%s2275_s3] ss:$0 sm:$0xff]  ;;  %s1767_s3 = smov 96   ;;  %vm162_vm5 = vcmask 261120   ;;  %s1771_s2 = smov 48  }
   0x9   :  { %v1627_v2 = vld [vmem:[%s2278_s6] sm:$0xff]  ;;  %s1772_s27 = smov [#allocation2]   ;;  %s1518_s29 = sshll.u32 %s2286_s14, 4  ;;  %s1519_s29 = int_to_ptr.hbm [resolvable:$true] %s1518_s29 }
   0xa   :  { %486 = vmatpush.bf16.msrb.mxu0 %v1867_v4  ;;  %174 = vmatmul.bf16.vlgmr.msra.gmra.mxu2 %v1765_v6  ;;  %v1914_v3 = vld [vmem:[%s2273_s1] sm:$0xf]  ;;  %s1516_s28 = sshll.u32 %s1772_s27, 4  ;;  %s1773_s30 = smov 112   ;;  %s1517_s28 = int_to_ptr.vmem [resolvable:$true] %s1516_s28 }
   0xb   :  { %358 = vmatpush.bf16.msrb.mxu2 %v1852_v0  ;;  %v121_v5 = vpack.c.bf16 %v1914_v3, %v1914_v3  ;;  %144 = vmatpush.bf16.msra.mxu1 %v1627_v2 }
   0xc   :  { %423 = vmatpush.bf16.msrb.mxu3 %v1852_v0 }
   0xe   :  { %1539 = vmatmul.msk.bf16.vlgmr.msra.gmra.mxu1 %vm94_vm0, %v121_v5 }
   0xf   :  { %359 = vmatpush.bf16.msrb.mxu2 %v1867_v4  ;;  %296 = vmatpush.bf16.msrb.mxu1 %v1852_v0 }
  0x10   :  { %424 = vmatpush.bf16.msrb.mxu3 %v1867_v4 }
  0x13   :  { %612 = vmatpush.bf16.msra.mxu2 %v1852_v0  ;;  %297 = vmatpush.bf16.msrb.mxu1 %v1867_v4 }
  0x17   :  { %613 = vmatpush.bf16.msra.mxu2 %v1867_v4  ;;  %550 = vmatpush.bf16.msra.mxu1 %v1852_v0 }
  0x1b   :  { %551 = vmatpush.bf16.msra.mxu1 %v1867_v4 }
  0x84   :  { %v110_v12 = vpop.f32.mrf.mxu0 }
  0x85   :  { %v1894_v13 = vadd.f32 %v1891_v11, %v110_v12 }
  0x8d   :  { %v175_v8 = vpop.f32.mrf.mxu2 }
  0x8e   :  { %v176_v9 = vadd.f32 %v1884_v7, %v175_v8 }
  0x90   :  { %200 = vrot.lane.b32.xlu0 %v176_v9, %s1766_s23  ;;  %v179_v14 = vadd.f32 %v176_v9, %v1894_v13 }
  0x92   :  { %v1548_v15 = vmul.f32 -1.442695, %v179_v14  ;;  %v1924_v14 = vpop.f32.mrf.mxu1 }
  0x94   :  { %1643 = vpow2.f32 %v1548_v15 }
  0x95   :  { %v177_v10 = vpop.f32.mrf.mxu2 }
  0x9a   :  { %v1644_v16 = vpop.eup %1643  ;;  %v148_v15 = vpop.f32.mrf.mxu1 }
  0x9b   :  { %v183_v17 = vadd.f32 1.0, %v1644_v16 }
  0x9d   :  { %1645 = vrcp.f32 %v183_v17  ;;  %v195_v23 = vand.u32 2147483648, %v183_v17  ;;  %vm189_vm2 = vweird.f32 %v183_v17  ;;  %v193_v24 = vand.u32 2147483647, %v183_v17 }
  0x9f   :  { %v196_v26 = vor.u32 1.1754944e-38, %v195_v23  ;;  %vm194_vm4 = vcmp.eq.f32.partialorder %v193_v24, 8.507059e+37 }
  0xa3   :  { %v1646_v18 = vpop.eup %1645 }
  0xa4   :  { %v185_v19 = vmul.f32 %v1646_v18, %v183_v17  ;;  %vm190_vm1 = vweird.f32 %v1646_v18  ;;  %v112_v17 = vpop.f32.mrf.mxu0 }
  0xa5   :  { %vm191_vm3 = vmor %vm189_vm2, %vm190_vm1  ;;  %v1928_v0 = vadd.f32 %v1891_v11, %v112_v17 }
  0xa6   :  { %v186_v20 = vsub.f32 1.0, %v185_v19 }
  0xa8   :  { %v187_v21 = vmul.f32 %v1646_v18, %v186_v20 }
  0xaa   :  { %v188_v22 = vadd.f32 %v1646_v18, %v187_v21 }
  0xac   :  { %v192_v25 = vsel %vm191_vm3, %v1646_v18, %v188_v22 }
  0xad   :  { %v197_v28 = vsel %vm194_vm4, %v196_v26, %v192_v25 }
  0xae   :  { %v210_v33 = vsub.f32 1.0, %v197_v28  ;;  %v216_v35 = vmul.f32 0.0, %v197_v28 }
 0x102   :  { %v201_v27 = vpop.permute.xlu0 %200 }
 0x103   :  { %v203_v29 = vmul.f32 %v201_v27, %v197_v28 }
 0x105   :  { %205 = vrot.lane.b32.xlu0 %v203_v29, %s1766_s23 }
 0x177   :  { %v206_v30 = vpop.permute.xlu0 %205 }
 0x178   :  { %v208_v31 = vadd.f32 %v206_v30, %v1894_v13 }
 0x17a   :  { %1647 = vtanh.f32 %v208_v31 }
 0x180   :  { %v1648_v32 = vpop.eup %1647 }
 0x181   :  { %212 = vrot.lane.b32.xlu1 %v1648_v32, %s1767_s3 }
 0x1f3   :  { %v213_v34 = vpop.permute.xlu1 %212 }
 0x1f4   :  { %v215_v36 = vmul.f32 %v213_v34, %v210_v33 }
 0x1f6   :  { %v217_v37 = vadd.f32 %v216_v35, %v215_v36 }
 0x1f8   :  { %v218_v38 = vpack.c.bf16 %v217_v37, %v217_v37  ;;  %v278_v56 = vrot.slane %v217_v37, 4 }
 0x1fa   :  { %220 = vrot.lane.b32.xlu1 %v218_v38, %s1767_s3 }
 0x26c   :  { %v221_v39 = vpop.permute.xlu1 %220 }
 0x26d   :  { %1549 = vmatmul.msk.bf16.vlgmr.msra.gmra.mxu3 %vm162_vm5, %v221_v39 }
 0x2f0   :  { %v234_v40 = vpop.f32.mrf.mxu3 }
 0x2f1   :  { %v235_v41 = vadd.f32 %v1884_v7, %v234_v40 }
 0x2f3   :  { %v239_v42 = vrot.slane %v235_v41, 4 }
 0x2f5   :  { %v241_v43 = vadd.f32 %v239_v42, %v1894_v13  ;;  %261 = vrot.lane.b32.xlu2 %v239_v42, %s1766_s23 }
 0x2f7   :  { %v1550_v44 = vmul.f32 -1.442695, %v241_v43 }
 0x2f8   :  { %v236_v45 = vpop.f32.mrf.mxu3 }
 0x2f9   :  { %1649 = vpow2.f32 %v1550_v44 }
 0x2ff   :  { %v1650_v46 = vpop.eup %1649 }
 0x300   :  { %v245_v47 = vadd.f32 1.0, %v1650_v46 }
 0x302   :  { %1651 = vrcp.f32 %v245_v47  ;;  %v257_v51 = vand.u32 2147483648, %v245_v47  ;;  %v255_v53 = vand.u32 2147483647, %v245_v47  ;;  %vm251_vm7 = vweird.f32 %v245_v47 }
 0x304   :  { %v258_v55 = vor.u32 1.1754944e-38, %v257_v51  ;;  %vm256_vm9 = vcmp.eq.f32.partialorder %v255_v53, 8.507059e+37 }
 0x308   :  { %v1652_v48 = vpop.eup %1651 }
 0x309   :  { %v247_v49 = vmul.f32 %v1652_v48, %v245_v47  ;;  %vm252_vm6 = vweird.f32 %v1652_v48 }
 0x30a   :  { %vm253_vm8 = vmor %vm251_vm7, %vm252_vm6 }
 0x30b   :  { %v248_v50 = vsub.f32 1.0, %v247_v49 }
 0x30d   :  { %v249_v52 = vmul.f32 %v1652_v48, %v248_v50 }
 0x30f   :  { %v250_v54 = vadd.f32 %v1652_v48, %v249_v52 }
 0x311   :  { %v254_v57 = vsel %vm253_vm8, %v1652_v48, %v250_v54 }
 0x312   :  { %v259_v58 = vsel %vm256_vm9, %v258_v55, %v254_v57 }
 0x313   :  { %v280_v59 = vmul.f32 %v278_v56, %v259_v58  ;;  %v271_v6 = vsub.f32 1.0, %v259_v58 }
 0x34f   :  { %v262_v60 = vpop.permute.xlu2 %261 }
 0x350   :  { %v264_v61 = vmul.f32 %v262_v60, %v259_v58 }
 0x352   :  { %266 = vrot.lane.b32.xlu2 %v264_v61, %s1766_s23 }
 0x3ac   :  { %v267_v62 = vpop.permute.xlu2 %266 }
 0x3ad   :  { %v269_v63 = vadd.f32 %v267_v62, %v1894_v13 }
 0x3af   :  { %1653 = vtanh.f32 %v269_v63 }
 0x3b5   :  { %v1654_v1 = vpop.eup %1653 }
 0x3b6   :  { %273 = vrot.lane.b32.xlu0 %v1654_v1, %s1767_s3 }
 0x428   :  { %v274_v8 = vpop.permute.xlu0 %273 }
 0x429   :  { %v276_v9 = vmul.f32 %v274_v8, %v271_v6 }
 0x42b   :  { %v281_v10 = vadd.f32 %v280_v59, %v276_v9 }
 0x42d   :  { %v282_v12 = vpack.c.bf16 %v281_v10, %v281_v10  ;;  %v341_v32 = vrot.slane %v281_v10, 4 }
 0x42f   :  { %v284_v13 = vrot.slane %v282_v12, 2 }
 0x431   :  { %285 = vrot.lane.b32.xlu1 %v284_v13, %s1767_s3 }
 0x4a3   :  { %v286_v16 = vpop.permute.xlu1 %285 }
 0x4a4   :  { %1551 = vmatmul.msk.bf16.vlgmr.msrb.gmra.mxu1 %vm162_vm5, %v286_v16 }
 0x521   :  { %v299_v18 = vpop.f32.mrf.mxu1 }
 0x522   :  { %v300_v4 = vadd.f32 %v1884_v7, %v299_v18 }
 0x524   :  { %v303_v19 = vadd.f32 %v300_v4, %v1928_v0  ;;  %324 = vrot.lane.b32.xlu2 %v300_v4, %s1766_s23 }
 0x526   :  { %v1552_v20 = vmul.f32 -1.442695, %v303_v19  ;;  %v78_v19 = vld [vmem:[%s2272_s0 + $0x10] sm:$0xff] }
 0x528   :  { %1655 = vpow2.f32 %v1552_v20 }
 0x529   :  { %v301_v21 = vpop.f32.mrf.mxu1 }
 0x52e   :  { %v1656_v22 = vpop.eup %1655 }
 0x52f   :  { %v307_v23 = vadd.f32 1.0, %v1656_v22 }
 0x531   :  { %1657 = vrcp.f32 %v307_v23  ;;  %v319_v27 = vand.u32 2147483648, %v307_v23  ;;  %v317_v29 = vand.u32 2147483647, %v307_v23  ;;  %vm313_vm11 = vweird.f32 %v307_v23 }
 0x533   :  { %v320_v31 = vor.u32 1.1754944e-38, %v319_v27  ;;  %vm318_vm13 = vcmp.eq.f32.partialorder %v317_v29, 8.507059e+37 }
 0x537   :  { %v1658_v24 = vpop.eup %1657 }
 0x538   :  { %v309_v25 = vmul.f32 %v1658_v24, %v307_v23  ;;  %vm314_vm10 = vweird.f32 %v1658_v24 }
 0x539   :  { %vm315_vm12 = vmor %vm313_vm11, %vm314_vm10 }
 0x53a   :  { %v310_v26 = vsub.f32 1.0, %v309_v25 }
 0x53c   :  { %v311_v28 = vmul.f32 %v1658_v24, %v310_v26 }
 0x53e   :  { %v312_v30 = vadd.f32 %v1658_v24, %v311_v28 }
 0x540   :  { %v316_v33 = vsel %vm315_vm12, %v1658_v24, %v312_v30 }
 0x541   :  { %v321_v34 = vsel %vm318_vm13, %v320_v31, %v316_v33 }
 0x542   :  { %v343_v35 = vmul.f32 %v341_v32, %v321_v34  ;;  %v334_v41 = vsub.f32 1.0, %v321_v34 }
 0x57e   :  { %v325_v36 = vpop.permute.xlu2 %324 }
 0x57f   :  { %v327_v37 = vmul.f32 %v325_v36, %v321_v34 }
 0x581   :  { %329 = vrot.lane.b32.xlu0 %v327_v37, %s1766_s23 }
 0x5f3   :  { %v330_v38 = vpop.permute.xlu0 %329 }
 0x5f4   :  { %v332_v39 = vadd.f32 %v330_v38, %v1928_v0 }
 0x5f6   :  { %1659 = vtanh.f32 %v332_v39 }
 0x5fc   :  { %v1660_v40 = vpop.eup %1659 }
 0x5fd   :  { %336 = vrot.lane.b32.xlu1 %v1660_v40, %s1767_s3 }
 0x66f   :  { %v337_v42 = vpop.permute.xlu1 %336 }
 0x670   :  { %v339_v43 = vmul.f32 %v337_v42, %v334_v41 }
 0x672   :  { %v344_v44 = vadd.f32 %v343_v35, %v339_v43 }
 0x674   :  { %v345_v45 = vpack.c.bf16 %v344_v44, %v344_v44  ;;  %v405_v10 = vrot.slane %v344_v44, 4 }
 0x676   :  { %347 = vrot.lane.b32.xlu2 %v345_v45, %s1767_s3 }
 0x6d0   :  { %v348_v46 = vpop.permute.xlu2 %347 }
 0x6d1   :  { %1553 = vmatmul.msk.bf16.vlgmr.msrb.gmra.mxu2 %vm162_vm5, %v348_v46 }
 0x754   :  { %v361_v47 = vpop.f32.mrf.mxu2 }
 0x755   :  { %v362_v48 = vadd.f32 %v1884_v7, %v361_v47 }
 0x757   :  { %v366_v49 = vrot.slane %v362_v48, 4 }
 0x759   :  { %388 = vrot.lane.b32.xlu0 %v366_v49, %s1766_s23  ;;  %v368_v51 = vadd.f32 %v366_v49, %v1928_v0 }
 0x75b   :  { %v1554_v52 = vmul.f32 -1.442695, %v368_v51 }
 0x75c   :  { %v363_v50 = vpop.f32.mrf.mxu2 }
 0x75d   :  { %1661 = vpow2.f32 %v1554_v52 }
 0x763   :  { %v1662_v53 = vpop.eup %1661 }
 0x764   :  { %v372_v54 = vadd.f32 1.0, %v1662_v53 }
 0x766   :  { %1663 = vrcp.f32 %v372_v54  ;;  %v384_v60 = vand.u32 2147483648, %v372_v54  ;;  %vm378_vm15 = vweird.f32 %v372_v54  ;;  %v382_v61 = vand.u32 2147483647, %v372_v54 }
 0x768   :  { %v385_v63 = vor.u32 1.1754944e-38, %v384_v60  ;;  %vm383_vm2 = vcmp.eq.f32.partialorder %v382_v61, 8.507059e+37 }
 0x76c   :  { %v1664_v55 = vpop.eup %1663 }
 0x76d   :  { %v374_v56 = vmul.f32 %v1664_v55, %v372_v54  ;;  %vm379_vm14 = vweird.f32 %v1664_v55 }
 0x76e   :  { %vm380_vm1 = vmor %vm378_vm15, %vm379_vm14 }
 0x76f   :  { %v375_v57 = vsub.f32 1.0, %v374_v56 }
 0x771   :  { %v376_v58 = vmul.f32 %v1664_v55, %v375_v57 }
 0x773   :  { %v377_v59 = vadd.f32 %v1664_v55, %v376_v58 }
 0x775   :  { %v381_v62 = vsel %vm380_vm1, %v1664_v55, %v377_v59 }
 0x776   :  { %v386_v2 = vsel %vm383_vm2, %v385_v63, %v381_v62 }
 0x777   :  { %v398_v12 = vsub.f32 1.0, %v386_v2  ;;  %v407_v15 = vmul.f32 %v405_v10, %v386_v2 }
 0x7cb   :  { %v389_v1 = vpop.permute.xlu0 %388 }
 0x7cc   :  { %v391_v5 = vmul.f32 %v389_v1, %v386_v2 }
 0x7ce   :  { %393 = vrot.lane.b32.xlu1 %v391_v5, %s1766_s23 }
 0x840   :  { %v394_v6 = vpop.permute.xlu1 %393 }
 0x841   :  { %v396_v8 = vadd.f32 %v394_v6, %v1928_v0  ;;  %v79_v0 = vld [vmem:[%s2272_s0 + $0x18] sm:$0xff] }
 0x842   :  { %v81_v20 = vpack.c.bf16 %v79_v0, %v78_v19 }
 0x843   :  { %1665 = vtanh.f32 %v396_v8 }
 0x844   :  { %1534 = vmatmul.msk.bf16.gmra.mxu0 %vm94_vm0, %v81_v20 }
 0x849   :  { %v1666_v9 = vpop.eup %1665 }
 0x84a   :  { %400 = vrot.lane.b32.xlu2 %v1666_v9, %s1767_s3 }
 0x8a4   :  { %v401_v13 = vpop.permute.xlu2 %400 }
 0x8a5   :  { %v403_v16 = vmul.f32 %v401_v13, %v398_v12 }
 0x8a7   :  { %v408_v17 = vadd.f32 %v407_v15, %v403_v16 }
 0x8a9   :  { %v409_v18 = vpack.c.bf16 %v408_v17, %v408_v17  ;;  %v468_v46 = vrot.slane %v408_v17, 4 }
 0x8ab   :  { %v411_v4 = vrot.slane %v409_v18, 2 }
 0x8ad   :  { %412 = vrot.lane.b32.xlu0 %v411_v4, %s1767_s3 }
 0x8c1   :  { %v115_v25 = vpop.f32.mrf.mxu0 }
 0x8c2   :  { %v1956_v26 = vadd.f32 %v1891_v11, %v115_v25 }
 0x8c9   :  { %v117_v54 = vpop.f32.mrf.mxu0 }
 0x91f   :  { %v413_v21 = vpop.permute.xlu0 %412 }
 0x920   :  { %1555 = vmatmul.msk.bf16.vlgmr.msrb.gmra.mxu3 %vm162_vm5, %v413_v21 }
 0x9a3   :  { %v426_v22 = vpop.f32.mrf.mxu3 }
 0x9a4   :  { %v427_v23 = vadd.f32 %v1884_v7, %v426_v22 }
 0x9a6   :  { %451 = vrot.lane.b32.xlu1 %v427_v23, %s1766_s23  ;;  %v430_v27 = vadd.f32 %v427_v23, %v1956_v26 }
 0x9a8   :  { %v1556_v28 = vmul.f32 -1.442695, %v430_v27 }
 0x9aa   :  { %1667 = vpow2.f32 %v1556_v28 }
 0x9ab   :  { %v428_v24 = vpop.f32.mrf.mxu3 }
 0x9b0   :  { %v1668_v29 = vpop.eup %1667 }
 0x9b1   :  { %v434_v30 = vadd.f32 1.0, %v1668_v29 }
 0x9b3   :  { %1669 = vrcp.f32 %v434_v30  ;;  %v446_v36 = vand.u32 2147483648, %v434_v30  ;;  %vm440_vm3 = vweird.f32 %v434_v30  ;;  %v444_v37 = vand.u32 2147483647, %v434_v30 }
 0x9b5   :  { %v447_v39 = vor.u32 1.1754944e-38, %v446_v36  ;;  %vm445_vm6 = vcmp.eq.f32.partialorder %v444_v37, 8.507059e+37 }
 0x9b9   :  { %v1670_v31 = vpop.eup %1669 }
 0x9ba   :  { %v436_v32 = vmul.f32 %v1670_v31, %v434_v30  ;;  %vm441_vm0 = vweird.f32 %v1670_v31  ;;  %v1975_v30 = vadd.f32 %v1891_v11, %v117_v54 }
 0x9bb   :  { %vm442_vm4 = vmor %vm440_vm3, %vm441_vm0 }
 0x9bc   :  { %v437_v33 = vsub.f32 1.0, %v436_v32 }
 0x9be   :  { %v438_v34 = vmul.f32 %v1670_v31, %v437_v33 }
 0x9c0   :  { %v439_v35 = vadd.f32 %v1670_v31, %v438_v34 }
 0x9c2   :  { %v443_v38 = vsel %vm442_vm4, %v1670_v31, %v439_v35 }
 0x9c3   :  { %v448_v41 = vsel %vm445_vm6, %v447_v39, %v443_v38 }
 0x9c4   :  { %v461_v47 = vsub.f32 1.0, %v448_v41  ;;  %v470_v49 = vmul.f32 %v468_v46, %v448_v41 }
 0xa18   :  { %v452_v40 = vpop.permute.xlu1 %451 }
 0xa19   :  { %v454_v42 = vmul.f32 %v452_v40, %v448_v41 }
 0xa1b   :  { %456 = vrot.lane.b32.xlu2 %v454_v42, %s1766_s23 }
 0xa75   :  { %v457_v43 = vpop.permute.xlu2 %456 }
 0xa76   :  { %v459_v44 = vadd.f32 %v457_v43, %v1956_v26 }
 0xa78   :  { %1671 = vtanh.f32 %v459_v44 }
 0xa7e   :  { %v1672_v45 = vpop.eup %1671 }
 0xa7f   :  { %463 = vrot.lane.b32.xlu0 %v1672_v45, %s1767_s3 }
 0xaf1   :  { %v464_v48 = vpop.permute.xlu0 %463 }
 0xaf2   :  { %v466_v50 = vmul.f32 %v464_v48, %v461_v47 }
 0xaf4   :  { %v471_v51 = vadd.f32 %v470_v49, %v466_v50 }
 0xaf6   :  { %v472_v52 = vpack.c.bf16 %v471_v51, %v471_v51  ;;  %v532_v12 = vrot.slane %v471_v51, 4 }
 0xaf8   :  { %474 = vrot.lane.b32.xlu1 %v472_v52, %s1767_s3 }
 0xb6a   :  { %v475_v53 = vpop.permute.xlu1 %474 }
 0xb6b   :  { %1557 = vmatmul.msk.bf16.vlgmr.msrb.gmra.mxu0 %vm162_vm5, %v475_v53 }
 0xbe8   :  { %v488_v55 = vpop.f32.mrf.mxu0 }
 0xbe9   :  { %v489_v56 = vadd.f32 %v1884_v7, %v488_v55 }
 0xbeb   :  { %v493_v57 = vrot.slane %v489_v56, 4 }
 0xbed   :  { %v495_v58 = vadd.f32 %v493_v57, %v1956_v26  ;;  %515 = vrot.lane.b32.xlu2 %v493_v57, %s1766_s23 }
 0xbef   :  { %v1558_v59 = vmul.f32 -1.442695, %v495_v58 }
 0xbf0   :  { %v490_v60 = vpop.f32.mrf.mxu0 }
 0xbf1   :  { %1673 = vpow2.f32 %v1558_v59 }
 0xbf7   :  { %v1674_v61 = vpop.eup %1673 }
 0xbf8   :  { %v499_v62 = vadd.f32 1.0, %v1674_v61 }
 0xbfa   :  { %1675 = vrcp.f32 %v499_v62  ;;  %v511_v5 = vand.u32 2147483648, %v499_v62  ;;  %v509_v8 = vand.u32 2147483647, %v499_v62  ;;  %vm505_vm8 = vweird.f32 %v499_v62 }
 0xbfc   :  { %v512_v10 = vor.u32 1.1754944e-38, %v511_v5  ;;  %vm510_vm10 = vcmp.eq.f32.partialorder %v509_v8, 8.507059e+37 }
 0xc00   :  { %v1676_v63 = vpop.eup %1675 }
 0xc01   :  { %v501_v1 = vmul.f32 %v1676_v63, %v499_v62  ;;  %vm506_vm7 = vweird.f32 %v1676_v63 }
 0xc02   :  { %vm507_vm9 = vmor %vm505_vm8, %vm506_vm7  ;;  %vm817_vm8 = vcmask 125952  }
 0xc03   :  { %v502_v2 = vsub.f32 1.0, %v501_v1 }
 0xc05   :  { %v503_v6 = vmul.f32 %v1676_v63, %v502_v2 }
 0xc07   :  { %v504_v9 = vadd.f32 %v1676_v63, %v503_v6 }
 0xc09   :  { %v508_v13 = vsel %vm507_vm9, %v1676_v63, %v504_v9 }
 0xc0a   :  { %v513_v15 = vsel %vm510_vm10, %v512_v10, %v508_v13 }
 0xc0b   :  { %v534_v16 = vmul.f32 %v532_v12, %v513_v15  ;;  %v525_v20 = vsub.f32 1.0, %v513_v15 }
 0xc47   :  { %v516_v17 = vpop.permute.xlu2 %515 }
 0xc48   :  { %v518_v18 = vmul.f32 %v516_v17, %v513_v15 }
 0xc4a   :  { %520 = vrot.lane.b32.xlu0 %v518_v18, %s1766_s23 }
 0xcbc   :  { %v521_v4 = vpop.permute.xlu0 %520 }
 0xcbd   :  { %v523_v19 = vadd.f32 %v521_v4, %v1956_v26 }
 0xcbf   :  { %1677 = vtanh.f32 %v523_v19 }
 0xcc5   :  { %v1678_v0 = vpop.eup %1677 }
 0xcc6   :  { %527 = vrot.lane.b32.xlu1 %v1678_v0, %s1767_s3  ;;  %v1569_v0 = vld [vmem:[%s2280_s8 + $0x10] sm:$0xf] }
 0xd38   :  { %v528_v21 = vpop.permute.xlu1 %527 }
 0xd39   :  { %v530_v22 = vmul.f32 %v528_v21, %v525_v20  ;;  %v1623_v20 = vld [vmem:[%s2280_s8 + $0x14] sm:$0xf0]  ;;  %v1565_v21 = vld [vmem:[%s2280_s8] sm:$0xf] }
 0xd3b   :  { %v535_v23 = vadd.f32 %v534_v16, %v530_v22  ;;  %v1998_v22 = vor.u32 %v1623_v20, %v1569_v0 }
 0xd3d   :  { %v536_v24 = vpack.c.bf16 %v535_v23, %v535_v23  ;;  %v595_v49 = vrot.slane %v535_v23, 4  ;;  %v1621_v23 = vld [vmem:[%s2280_s8 + $0x4] sm:$0xf0]  ;;  %689 = vmatpush.bf16.msra.mxu3 %v1998_v22  ;;  %760 = vmatpush.bf16.msra.mxu0 %v1998_v22 }
 0xd3f   :  { %v538_v25 = vrot.slane %v536_v24, 2  ;;  %v2004_v24 = vor.u32 %v1621_v23, %v1565_v21 }
 0xd41   :  { %539 = vrot.lane.b32.xlu2 %v538_v25, %s1767_s3  ;;  %690 = vmatpush.bf16.msra.mxu3 %v2004_v24 }
 0xd42   :  { %761 = vmatpush.bf16.msra.mxu0 %v2004_v24 }
 0xd45   :  { %871 = vmatpush.bf16.msrb.mxu3 %v1998_v22 }
 0xd49   :  { %872 = vmatpush.bf16.msrb.mxu3 %v2004_v24 }
 0xd9b   :  { %v540_v27 = vpop.permute.xlu2 %539 }
 0xd9c   :  { %1559 = vmatmul.msk.bf16.vlgmr.msra.gmra.mxu1 %vm162_vm5, %v540_v27 }
 0xe19   :  { %v553_v28 = vpop.f32.mrf.mxu1 }
 0xe1a   :  { %v554_v29 = vadd.f32 %v1884_v7, %v553_v28 }
 0xe1c   :  { %578 = vrot.lane.b32.xlu0 %v554_v29, %s1766_s23  ;;  %v557_v31 = vadd.f32 %v554_v29, %v1975_v30 }
 0xe1e   :  { %v1560_v32 = vmul.f32 -1.442695, %v557_v31 }
 0xe20   :  { %1679 = vpow2.f32 %v1560_v32 }
 0xe21   :  { %v555_v26 = vpop.f32.mrf.mxu1 }
 0xe26   :  { %v1680_v33 = vpop.eup %1679 }
 0xe27   :  { %v561_v34 = vadd.f32 1.0, %v1680_v33 }
 0xe29   :  { %1681 = vrcp.f32 %v561_v34  ;;  %v573_v40 = vand.u32 2147483648, %v561_v34  ;;  %vm567_vm12 = vweird.f32 %v561_v34  ;;  %v571_v41 = vand.u32 2147483647, %v561_v34 }
 0xe2b   :  { %v574_v11 = vor.u32 1.1754944e-38, %v573_v40  ;;  %vm572_vm14 = vcmp.eq.f32.partialorder %v571_v41, 8.507059e+37 }
 0xe2f   :  { %v1682_v35 = vpop.eup %1681 }
 0xe30   :  { %v563_v36 = vmul.f32 %v1682_v35, %v561_v34  ;;  %vm568_vm11 = vweird.f32 %v1682_v35  ;;  %v1639_v34 = vld [vmem:[%s2279_s7] ss:$0 sm:$0xff] }
 0xe31   :  { %vm569_vm13 = vmor %vm567_vm12, %vm568_vm11 }
 0xe32   :  { %v564_v37 = vsub.f32 1.0, %v563_v36 }
 0xe34   :  { %v565_v38 = vmul.f32 %v1682_v35, %v564_v37  ;;  %v2022_v37 = vadd.f32 %v1639_v34, %v1924_v14 }
 0xe36   :  { %v566_v39 = vadd.f32 %v1682_v35, %v565_v38 }
 0xe38   :  { %v570_v42 = vsel %vm569_vm13, %v1682_v35, %v566_v39  ;;  %v2019_v35 = vld [vmem:[%s2281_s9] ss:$0 sm:$0xff] }
 0xe39   :  { %v575_v44 = vsel %vm572_vm14, %v574_v11, %v570_v42 }
 0xe3a   :  { %v588_v50 = vsub.f32 1.0, %v575_v44  ;;  %v597_v52 = vmul.f32 %v595_v49, %v575_v44 }
 0xe8e   :  { %v579_v43 = vpop.permute.xlu0 %578 }
 0xe8f   :  { %v581_v45 = vmul.f32 %v579_v43, %v575_v44 }
 0xe91   :  { %583 = vrot.lane.b32.xlu1 %v581_v45, %s1766_s23 }
 0xf03   :  { %v584_v46 = vpop.permute.xlu1 %583 }
 0xf04   :  { %v586_v47 = vadd.f32 %v584_v46, %v1975_v30 }
 0xf06   :  { %1683 = vtanh.f32 %v586_v47 }
 0xf0c   :  { %v1684_v48 = vpop.eup %1683 }
 0xf0d   :  { %590 = vrot.lane.b32.xlu2 %v1684_v48, %s1767_s3 }
 0xf67   :  { %v591_v51 = vpop.permute.xlu2 %590 }
 0xf68   :  { %v593_v53 = vmul.f32 %v591_v51, %v588_v50 }
 0xf6a   :  { %v598_v54 = vadd.f32 %v597_v52, %v593_v53 }
 0xf6c   :  { %v599_v55 = vpack.c.bf16 %v598_v54, %v598_v54  ;;  %v659_v25 = vrot.slane %v598_v54, 4 }
 0xf6e   :  { %601 = vrot.lane.b32.xlu0 %v599_v55, %s1767_s3 }
 0xfe0   :  { %v602_v56 = vpop.permute.xlu0 %601 }
 0xfe1   :  { %1561 = vmatmul.msk.bf16.vlgmr.msra.gmra.mxu2 %vm162_vm5, %v602_v56 }
0x1064   :  { %v615_v57 = vpop.f32.mrf.mxu2 }
0x1065   :  { %v616_v58 = vadd.f32 %v1884_v7, %v615_v57 }
0x1067   :  { %v620_v59 = vrot.slane %v616_v58, 4 }
0x1069   :  { %642 = vrot.lane.b32.xlu1 %v620_v59, %s1766_s23  ;;  %v622_v61 = vadd.f32 %v620_v59, %v1975_v30  ;;  %v1622_v59 = vld [vmem:[%s2280_s8 + $0x14] sm:$0xf] }
0x106b   :  { %v1562_v62 = vmul.f32 -1.442695, %v622_v61  ;;  %v1620_v61 = vld [vmem:[%s2280_s8 + $0x4] sm:$0xf] }
0x106c   :  { %v617_v60 = vpop.f32.mrf.mxu2 }
0x106d   :  { %1685 = vpow2.f32 %v1562_v62  ;;  %v1577_v60 = vld [vmem:[%s2280_s8 + $0x18] sm:$0xf0] }
0x106e   :  { %v2039_v62 = vor.u32 %v1622_v59, %v1577_v60 }
0x1070   :  { %773 = vmatpush.bf16.msrb.mxu1 %v2039_v62  ;;  %884 = vmatpush.bf16.msrb.mxu0 %v2039_v62 }
0x1073   :  { %v1686_v63 = vpop.eup %1685 }
0x1074   :  { %v626_v1 = vadd.f32 1.0, %v1686_v63  ;;  %v1573_v63 = vld [vmem:[%s2280_s8 + $0x8] sm:$0xf0]  ;;  %s1768_s8 = smov 32  }
0x1076   :  { %1687 = vrcp.f32 %v626_v1  ;;  %v638_v10 = vand.u32 2147483648, %v626_v1  ;;  %vm632_vm1 = vweird.f32 %v626_v1  ;;  %v636_v7 = vand.u32 2147483647, %v626_v1 }
0x1078   :  { %v639_v13 = vor.u32 1.1754944e-38, %v638_v10  ;;  %vm637_vm0 = vcmp.eq.f32.partialorder %v636_v7, 8.507059e+37 }
0x107c   :  { %v1688_v2 = vpop.eup %1687 }
0x107d   :  { %v628_v5 = vmul.f32 %v1688_v2, %v626_v1  ;;  %vm633_vm15 = vweird.f32 %v1688_v2  ;;  %v2047_v1 = vld [vmem:[%s2283_s11 + $0x8] sm:$0xff] }
0x107e   :  { %vm634_vm2 = vmor %vm632_vm1, %vm633_vm15  ;;  %809 = vmatpush.bf16.msrb.mxu2 %v2047_v1 }
0x107f   :  { %v629_v6 = vsub.f32 1.0, %v628_v5  ;;  %v2056_v5 = vld [vmem:[%s2283_s11] sm:$0xff] }
0x1081   :  { %v630_v8 = vmul.f32 %v1688_v2, %v629_v6 }
0x1082   :  { %810 = vmatpush.bf16.msrb.mxu2 %v2056_v5 }
0x1083   :  { %v631_v9 = vadd.f32 %v1688_v2, %v630_v8 }
0x1085   :  { %v635_v12 = vsel %vm634_vm2, %v1688_v2, %v631_v9  ;;  %v2050_v2 = vor.u32 %v1620_v61, %v1573_v63 }
0x1086   :  { %v640_v16 = vsel %vm637_vm0, %v639_v13, %v635_v12  ;;  %974 = vmatpush.bf16.msra.mxu2 %v1998_v22 }
0x1087   :  { %v652_v27 = vsub.f32 1.0, %v640_v16  ;;  %v661_v29 = vmul.f32 %v659_v25, %v640_v16  ;;  %774 = vmatpush.bf16.msrb.mxu1 %v2050_v2  ;;  %885 = vmatpush.bf16.msrb.mxu0 %v2050_v2  ;;  %v2102_v25 = vld [vmem:[%s2282_s10] ss:$0 sm:$0xff]  ;;  %s1769_s10 = smov 16  }
0x108a   :  { %975 = vmatpush.bf16.msra.mxu2 %v2004_v24 }
0x108b   :  { %908 = vmatpush.bf16.msra.mxu1 %v2047_v1 }
0x108f   :  { %909 = vmatpush.bf16.msra.mxu1 %v2056_v5 }
0x10db   :  { %v643_v15 = vpop.permute.xlu1 %642 }
0x10dc   :  { %v645_v17 = vmul.f32 %v643_v15, %v640_v16 }
0x10de   :  { %647 = vrot.lane.b32.xlu2 %v645_v17, %s1766_s23  ;;  %v2089_v17 = vld [vmem:[%s2284_s12] ss:$0 sm:$0xff] }
0x1138   :  { %v648_v18 = vpop.permute.xlu2 %647 }
0x1139   :  { %v650_v4 = vadd.f32 %v648_v18, %v1975_v30 }
0x113b   :  { %1689 = vtanh.f32 %v650_v4 }
0x1141   :  { %v1690_v19 = vpop.eup %1689 }
0x1142   :  { %654 = vrot.lane.b32.xlu0 %v1690_v19, %s1767_s3 }
0x11b4   :  { %v655_v28 = vpop.permute.xlu0 %654 }
0x11b5   :  { %v657_v26 = vmul.f32 %v655_v28, %v652_v27 }
0x11b7   :  { %v662_v30 = vadd.f32 %v661_v29, %v657_v26 }
0x11b9   :  { %v663_v31 = vpack.c.bf16 %v662_v30, %v662_v30  ;;  %v735_v50 = vrot.slane %v662_v30, 4 }
0x11bb   :  { %v665_v32 = vrot.slane %v663_v31, 2 }
0x11bd   :  { %666 = vrot.lane.b32.xlu1 %v665_v32, %s1767_s3 }
0x122f   :  { %v667_v33 = vpop.permute.xlu1 %666 }
0x1230   :  { %1571 = vmatmul.msk.bf16.vlgmr.msra.gmra.mxu3 %vm162_vm5, %v667_v33 }
0x1231   :  { %987 = vmatpush.bf16.msra.mxu3 %v2039_v62 }
0x1235   :  { %988 = vmatpush.bf16.msra.mxu3 %v2050_v2 }
0x12b3   :  { %v692_v36 = vpop.f32.mrf.mxu3 }
0x12b4   :  { %v696_v38 = vadd.f32 %v2019_v35, %v692_v36 }
0x12b6   :  { %v697_v39 = vadd.f32 %v696_v38, %v2022_v37  ;;  %718 = vrot.lane.b32.xlu2 %v696_v38, %s1766_s23 }
0x12b8   :  { %v1572_v40 = vmul.f32 -1.442695, %v697_v39 }
0x12ba   :  { %1691 = vpow2.f32 %v1572_v40 }
0x12bb   :  { %v694_v41 = vpop.f32.mrf.mxu3 }
0x12c0   :  { %v1692_v42 = vpop.eup %1691 }
0x12c1   :  { %v701_v11 = vadd.f32 1.0, %v1692_v42 }
0x12c3   :  { %1693 = vrcp.f32 %v701_v11  ;;  %v713_v46 = vand.u32 2147483648, %v701_v11  ;;  %v711_v14 = vand.u32 2147483647, %v701_v11  ;;  %vm707_vm4 = vweird.f32 %v701_v11 }
0x12c5   :  { %v714_v49 = vor.u32 1.1754944e-38, %v713_v46  ;;  %vm712_vm7 = vcmp.eq.f32.partialorder %v711_v14, 8.507059e+37 }
0x12c9   :  { %v1694_v43 = vpop.eup %1693 }
0x12ca   :  { %v703_v44 = vmul.f32 %v1694_v43, %v701_v11  ;;  %vm708_vm3 = vweird.f32 %v1694_v43 }
0x12cb   :  { %vm709_vm6 = vmor %vm707_vm4, %vm708_vm3 }
0x12cc   :  { %v704_v45 = vsub.f32 1.0, %v703_v44 }
0x12ce   :  { %v705_v47 = vmul.f32 %v1694_v43, %v704_v45 }
0x12d0   :  { %v706_v48 = vadd.f32 %v1694_v43, %v705_v47 }
0x12d2   :  { %v710_v51 = vsel %vm709_vm6, %v1694_v43, %v706_v48 }
0x12d3   :  { %v715_v52 = vsel %vm712_vm7, %v714_v49, %v710_v51 }
0x12d4   :  { %v737_v53 = vmul.f32 %v735_v50, %v715_v52  ;;  %v728_v6 = vsub.f32 1.0, %v715_v52 }
0x1310   :  { %v719_v54 = vpop.permute.xlu2 %718 }
0x1311   :  { %v721_v55 = vmul.f32 %v719_v54, %v715_v52 }
0x1313   :  { %723 = vrot.lane.b32.xlu0 %v721_v55, %s1766_s23 }
0x1385   :  { %v724_v56 = vpop.permute.xlu0 %723 }
0x1386   :  { %v726_v57 = vadd.f32 %v724_v56, %v2022_v37 }
0x1388   :  { %1695 = vtanh.f32 %v726_v57 }
0x138e   :  { %v1696_v58 = vpop.eup %1695 }
0x138f   :  { %730 = vrot.lane.b32.xlu1 %v1696_v58, %s1767_s3 }
0x1401   :  { %v731_v8 = vpop.permute.xlu1 %730 }
0x1402   :  { %v733_v9 = vmul.f32 %v731_v8, %v728_v6 }
0x1404   :  { %v2068_v10 = vadd.f32 %v737_v53, %v733_v9 }
0x1406   :  { %v739_v7 = vpack.c.bf16 %v2068_v10, %v2068_v10 }
0x1408   :  { %741 = vrot.lane.b32.xlu2 %v739_v7, %s1767_s3 }
0x1462   :  { %v742_v12 = vpop.permute.xlu2 %741 }
0x1463   :  { %1581 = vmatmul.msk.bf16.vlgmr.msra.gmra.mxu0 %vm162_vm5, %v742_v12  ;;  %1582 = vmatmul.msk.bf16.vlgmr.msrb.gmra.mxu1 %vm162_vm5, %v742_v12 }
0x1464   :  { %1591 = vmatmul.msk.bf16.vlgmr.msrb.gmra.mxu2 %vm162_vm5, %v742_v12  ;;  %1011 = vmatpush.bf16.msra.mxu0 %v2047_v1 }
0x1465   :  { %1090 = vmatpush.bf16.msrb.mxu2 %v2039_v62  ;;  %1077 = vmatpush.bf16.msrb.mxu1 %v1998_v22 }
0x1468   :  { %1012 = vmatpush.bf16.msra.mxu0 %v2056_v5 }
0x1469   :  { %1091 = vmatpush.bf16.msrb.mxu2 %v2050_v2  ;;  %1078 = vmatpush.bf16.msrb.mxu1 %v2004_v24 }
0x14e0   :  { %v763_v13 = vpop.f32.mrf.mxu0  ;;  %v776_v15 = vpop.f32.mrf.mxu1 }
0x14e1   :  { %v780_v16 = vadd.f32 %v2019_v35, %v763_v13  ;;  %785 = vrot.lane.b32.xlu1 %v776_v15, %s1768_s8  ;;  %783 = vrot.lane.b32.xlu0 %v763_v13, %s1768_s8 }
0x14e3   :  { %840 = vrot.lane.b32.xlu2 %v780_v16, %s1766_s23 }
0x14e7   :  { %v812_v18 = vpop.f32.mrf.mxu2 }
0x14e8   :  { %v813_v4 = vadd.f32 %v2089_v17, %v812_v18  ;;  %v765_v19 = vpop.f32.mrf.mxu0  ;;  %v778_v0 = vpop.f32.mrf.mxu1 }
0x14ea   :  { %v2093_v20 = vadd.f32 %v813_v4, %v1914_v3 }
0x14ec   :  { %818 = vst.msk [vmem:[%s2285_s13] sm:$0xf] %vm817_vm8, %v2093_v20 }
0x14ef   :  { %v814_v21 = vpop.f32.mrf.mxu2 }
0x153d   :  { %v841_v11 = vpop.permute.xlu2 %840 }
0x1553   :  { %v786_v23 = vpop.permute.xlu1 %785  ;;  %v784_v27 = vpop.permute.xlu0 %783 }
0x1554   :  { %v787_v28 = vsel %vm162_vm5, %v784_v27, %v786_v23 }
0x1555   :  { %v789_v29 = vadd.f32 %v787_v28, %v2022_v37 }
0x1557   :  { %v790_v3 = vadd.f32 %v2102_v25, %v789_v29 }
0x1559   :  { %v819_v26 = vadd.f32 %v790_v3, %v780_v16 }
0x155b   :  { %v1592_v30 = vmul.f32 -1.442695, %v819_v26 }
0x155d   :  { %1697 = vpow2.f32 %v1592_v30 }
0x1563   :  { %v1698_v31 = vpop.eup %1697 }
0x1564   :  { %v823_v32 = vadd.f32 1.0, %v1698_v31 }
0x1566   :  { %1699 = vrcp.f32 %v823_v32  ;;  %v835_v38 = vand.u32 2147483648, %v823_v32  ;;  %v833_v40 = vand.u32 2147483647, %v823_v32  ;;  %vm829_vm10 = vweird.f32 %v823_v32 }
0x1568   :  { %v836_v42 = vor.u32 1.1754944e-38, %v835_v38  ;;  %vm834_vm12 = vcmp.eq.f32.partialorder %v833_v40, 8.507059e+37 }
0x156c   :  { %v1700_v33 = vpop.eup %1699 }
0x156d   :  { %v825_v34 = vmul.f32 %v1700_v33, %v823_v32  ;;  %vm830_vm9 = vweird.f32 %v1700_v33 }
0x156e   :  { %vm831_vm11 = vmor %vm829_vm10, %vm830_vm9 }
0x156f   :  { %v826_v36 = vsub.f32 1.0, %v825_v34 }
0x1571   :  { %v827_v39 = vmul.f32 %v1700_v33, %v826_v36 }
0x1573   :  { %v828_v41 = vadd.f32 %v1700_v33, %v827_v39 }
0x1575   :  { %v832_v37 = vsel %vm831_vm11, %v1700_v33, %v828_v41 }
0x1576   :  { %v837_v43 = vsel %vm834_vm12, %v836_v42, %v832_v37 }
0x1577   :  { %v843_v44 = vmul.f32 %v841_v11, %v837_v43  ;;  %v850_v14 = vsub.f32 1.0, %v837_v43  ;;  %v856_v49 = vmul.f32 %v837_v43, %v2068_v10 }
0x1579   :  { %845 = vrot.lane.b32.xlu0 %v843_v44, %s1766_s23 }
0x15eb   :  { %v846_v45 = vpop.permute.xlu0 %845 }
0x15ec   :  { %v848_v46 = vadd.f32 %v846_v45, %v790_v3 }
0x15ee   :  { %1701 = vtanh.f32 %v848_v46 }
0x15f4   :  { %v1702_v47 = vpop.eup %1701 }
0x15f5   :  { %852 = vrot.lane.b32.xlu1 %v1702_v47, %s1767_s3 }
0x1667   :  { %v853_v48 = vpop.permute.xlu1 %852 }
0x1668   :  { %v855_v50 = vmul.f32 %v853_v48, %v850_v14 }
0x166a   :  { %v857_v51 = vadd.f32 %v856_v49, %v855_v50 }
0x166c   :  { %v858_v52 = vpack.c.bf16 %v857_v51, %v857_v51 }
0x166e   :  { %860 = vrot.lane.b32.xlu2 %v858_v52, %s1767_s3 }
0x16c8   :  { %v861_v53 = vpop.permute.xlu2 %860 }
0x16c9   :  { %1593 = vmatmul.msk.bf16.vlgmr.msrb.gmra.mxu3 %vm162_vm5, %v861_v53  ;;  %1594 = vmatmul.msk.bf16.vlgmr.msrb.gmra.mxu0 %vm162_vm5, %v861_v53 }
0x16ca   :  { %1595 = vmatmul.msk.bf16.vlgmr.msra.gmra.mxu1 %vm162_vm5, %v861_v53  ;;  %1114 = vmatpush.bf16.msrb.mxu3 %v2047_v1 }
0x16cb   :  { %1180 = vmatpush.bf16.msrb.mxu0 %v1998_v22  ;;  %1193 = vmatpush.bf16.msra.mxu1 %v2039_v62 }
0x16ce   :  { %1115 = vmatpush.bf16.msrb.mxu3 %v2056_v5 }
0x16cf   :  { %1181 = vmatpush.bf16.msrb.mxu0 %v2004_v24  ;;  %1194 = vmatpush.bf16.msra.mxu1 %v2050_v2 }
0x1746   :  { %v887_v54 = vpop.f32.mrf.mxu0 }
0x1747   :  { %v911_v55 = vpop.f32.mrf.mxu1  ;;  %896 = vrot.lane.b32.xlu1 %v887_v54, %s1768_s8 }
0x1748   :  { %v912_v41 = vadd.f32 %v2089_v17, %v911_v55 }
0x174a   :  { %v2144_v37 = vadd.f32 %v912_v41, %v2093_v20 }
0x174c   :  { %v874_v56 = vpop.f32.mrf.mxu3 }
0x174d   :  { %v891_v57 = vadd.f32 %v2019_v35, %v874_v56  ;;  %894 = vrot.lane.b32.xlu0 %v874_v56, %s1768_s8 }
0x174e   :  { %v889_v58 = vpop.f32.mrf.mxu0 }
0x174f   :  { %v913_v59 = vpop.f32.mrf.mxu1  ;;  %943 = vrot.lane.b32.xlu2 %v891_v57, %s1766_s23 }
0x1754   :  { %v876_v60 = vpop.f32.mrf.mxu3 }
0x17a9   :  { %v944_v28 = vpop.permute.xlu2 %943 }
0x17b9   :  { %v897_v61 = vpop.permute.xlu1 %896 }
0x17bf   :  { %v895_v63 = vpop.permute.xlu0 %894 }
0x17c0   :  { %v898_v6 = vsel %vm162_vm5, %v895_v63, %v897_v61 }
0x17c1   :  { %v900_v8 = vadd.f32 %v898_v6, %v790_v3 }
0x17c3   :  { %v2126_v9 = vadd.f32 %v2102_v25, %v900_v8 }
0x17c5   :  { %v922_v10 = vadd.f32 %v2126_v9, %v891_v57 }
0x17c7   :  { %v1596_v7 = vmul.f32 -1.442695, %v922_v10 }
0x17c9   :  { %1703 = vpow2.f32 %v1596_v7 }
0x17cf   :  { %v1704_v12 = vpop.eup %1703 }
0x17d0   :  { %v926_v13 = vadd.f32 1.0, %v1704_v12 }
0x17d2   :  { %1705 = vrcp.f32 %v926_v13  ;;  %v938_v4 = vand.u32 2147483648, %v926_v13  ;;  %v936_v0 = vand.u32 2147483647, %v926_v13  ;;  %vm932_vm14 = vweird.f32 %v926_v13 }
0x17d4   :  { %v939_v23 = vor.u32 1.1754944e-38, %v938_v4  ;;  %vm937_vm1 = vcmp.eq.f32.partialorder %v936_v0, 8.507059e+37 }
0x17d8   :  { %v1706_v15 = vpop.eup %1705 }
0x17d9   :  { %v928_v16 = vmul.f32 %v1706_v15, %v926_v13  ;;  %vm933_vm13 = vweird.f32 %v1706_v15 }
0x17da   :  { %vm934_vm15 = vmor %vm932_vm14, %vm933_vm13 }
0x17db   :  { %v929_v18 = vsub.f32 1.0, %v928_v16 }
0x17dd   :  { %v930_v19 = vmul.f32 %v1706_v15, %v929_v18 }
0x17df   :  { %v931_v21 = vadd.f32 %v1706_v15, %v930_v19 }
0x17e1   :  { %v935_v27 = vsel %vm934_vm15, %v1706_v15, %v931_v21 }
0x17e2   :  { %v940_v29 = vsel %vm937_vm1, %v939_v23, %v935_v27 }
0x17e3   :  { %v946_v3 = vmul.f32 %v944_v28, %v940_v29  ;;  %v953_v32 = vsub.f32 1.0, %v940_v29  ;;  %v959_v34 = vmul.f32 %v940_v29, %v857_v51 }
0x17e5   :  { %948 = vrot.lane.b32.xlu0 %v946_v3, %s1766_s23 }
0x1857   :  { %v949_v26 = vpop.permute.xlu0 %948 }
0x1858   :  { %v951_v30 = vadd.f32 %v949_v26, %v2126_v9 }
0x185a   :  { %1707 = vtanh.f32 %v951_v30 }
0x1860   :  { %v1708_v31 = vpop.eup %1707 }
0x1861   :  { %955 = vrot.lane.b32.xlu1 %v1708_v31, %s1767_s3 }
0x18d3   :  { %v956_v33 = vpop.permute.xlu1 %955 }
0x18d4   :  { %v958_v36 = vmul.f32 %v956_v33, %v953_v32 }
0x18d6   :  { %v960_v38 = vadd.f32 %v959_v34, %v958_v36 }
0x18d8   :  { %v961_v39 = vpack.c.bf16 %v960_v38, %v960_v38 }
0x18da   :  { %963 = vrot.lane.b32.xlu2 %v961_v39, %s1767_s3 }
0x1934   :  { %v964_v40 = vpop.permute.xlu2 %963 }
0x1935   :  { %1597 = vmatmul.msk.bf16.vlgmr.msra.gmra.mxu2 %vm162_vm5, %v964_v40  ;;  %1598 = vmatmul.msk.bf16.vlgmr.msra.gmra.mxu3 %vm162_vm5, %v964_v40 }
0x1936   :  { %1599 = vmatmul.msk.bf16.vlgmr.msra.gmra.mxu0 %vm162_vm5, %v964_v40  ;;  %1217 = vmatpush.bf16.msra.mxu2 %v2047_v1 }
0x1937   :  { %1283 = vmatpush.bf16.msra.mxu3 %v1998_v22  ;;  %1296 = vmatpush.bf16.msra.mxu0 %v2039_v62 }
0x193a   :  { %1218 = vmatpush.bf16.msra.mxu2 %v2056_v5 }
0x193b   :  { %1284 = vmatpush.bf16.msra.mxu3 %v2004_v24  ;;  %1297 = vmatpush.bf16.msra.mxu0 %v2050_v2 }
0x19b3   :  { %v1014_v42 = vpop.f32.mrf.mxu0 }
0x19b4   :  { %v1015_v11 = vadd.f32 %v2089_v17, %v1014_v42 }
0x19b6   :  { %v2148_v43 = vadd.f32 %v1015_v11, %v2144_v37 }
0x19b8   :  { %v977_v44 = vpop.f32.mrf.mxu2  ;;  %v990_v45 = vpop.f32.mrf.mxu3 }
0x19b9   :  { %v994_v46 = vadd.f32 %v2019_v35, %v977_v44  ;;  %997 = vrot.lane.b32.xlu0 %v977_v44, %s1768_s8  ;;  %999 = vrot.lane.b32.xlu1 %v990_v45, %s1768_s8 }
0x19bb   :  { %v1016_v47 = vpop.f32.mrf.mxu0  ;;  %1046 = vrot.lane.b32.xlu2 %v994_v46, %s1766_s23 }
0x19c0   :  { %v979_v14 = vpop.f32.mrf.mxu2  ;;  %v992_v48 = vpop.f32.mrf.mxu3 }
0x1a15   :  { %v1047_v10 = vpop.permute.xlu2 %1046 }
0x1a2b   :  { %v998_v20 = vpop.permute.xlu0 %997  ;;  %v1000_v49 = vpop.permute.xlu1 %999 }
0x1a2c   :  { %v1001_v50 = vsel %vm162_vm5, %v998_v20, %v1000_v49 }
0x1a2d   :  { %v1003_v51 = vadd.f32 %v1001_v50, %v2126_v9 }
0x1a2f   :  { %v1004_v52 = vadd.f32 %v2102_v25, %v1003_v51 }
0x1a31   :  { %v1025_v53 = vadd.f32 %v1004_v52, %v994_v46 }
0x1a33   :  { %v1600_v54 = vmul.f32 -1.442695, %v1025_v53 }
0x1a35   :  { %1709 = vpow2.f32 %v1600_v54 }
0x1a3b   :  { %v1710_v55 = vpop.eup %1709 }
0x1a3c   :  { %v1029_v56 = vadd.f32 1.0, %v1710_v55 }
0x1a3e   :  { %1711 = vrcp.f32 %v1029_v56  ;;  %v1041_v60 = vand.u32 2147483648, %v1029_v56  ;;  %v1039_v63 = vand.u32 2147483647, %v1029_v56  ;;  %vm1035_vm0 = vweird.f32 %v1029_v56 }
0x1a40   :  { %v1042_v8 = vor.u32 1.1754944e-38, %v1041_v60  ;;  %vm1040_vm4 = vcmp.eq.f32.partialorder %v1039_v63, 8.507059e+37 }
0x1a44   :  { %v1712_v57 = vpop.eup %1711 }
0x1a45   :  { %v1031_v58 = vmul.f32 %v1712_v57, %v1029_v56  ;;  %vm1036_vm2 = vweird.f32 %v1712_v57 }
0x1a46   :  { %vm1037_vm3 = vmor %vm1035_vm0, %vm1036_vm2 }
0x1a47   :  { %v1032_v59 = vsub.f32 1.0, %v1031_v58 }
0x1a49   :  { %v1033_v61 = vmul.f32 %v1712_v57, %v1032_v59 }
0x1a4b   :  { %v1034_v6 = vadd.f32 %v1712_v57, %v1033_v61 }
0x1a4d   :  { %v1038_v9 = vsel %vm1037_vm3, %v1712_v57, %v1034_v6 }
0x1a4e   :  { %v1043_v7 = vsel %vm1040_vm4, %v1042_v8, %v1038_v9 }
0x1a4f   :  { %v1049_v12 = vmul.f32 %v1047_v10, %v1043_v7  ;;  %v1056_v18 = vsub.f32 1.0, %v1043_v7  ;;  %v1062_v19 = vmul.f32 %v1043_v7, %v960_v38 }
0x1a51   :  { %1051 = vrot.lane.b32.xlu0 %v1049_v12, %s1766_s23 }
0x1ac3   :  { %v1052_v13 = vpop.permute.xlu0 %1051 }
0x1ac4   :  { %v1054_v15 = vadd.f32 %v1052_v13, %v1004_v52 }
0x1ac6   :  { %1713 = vtanh.f32 %v1054_v15 }
0x1acc   :  { %v1714_v16 = vpop.eup %1713 }
0x1acd   :  { %1058 = vrot.lane.b32.xlu1 %v1714_v16, %s1767_s3 }
0x1b3f   :  { %v1059_v4 = vpop.permute.xlu1 %1058 }
0x1b40   :  { %v1061_v0 = vmul.f32 %v1059_v4, %v1056_v18 }
0x1b42   :  { %v1063_v21 = vadd.f32 %v1062_v19, %v1061_v0 }
0x1b44   :  { %v1064_v23 = vpack.c.bf16 %v1063_v21, %v1063_v21 }
0x1b46   :  { %1066 = vrot.lane.b32.xlu2 %v1064_v23, %s1767_s3 }
0x1ba0   :  { %v1067_v27 = vpop.permute.xlu2 %1066 }
0x1ba1   :  { %1601 = vmatmul.msk.bf16.vlgmr.msrb.gmra.mxu1 %vm162_vm5, %v1067_v27  ;;  %1602 = vmatmul.msk.bf16.vlgmr.msrb.gmra.mxu2 %vm162_vm5, %v1067_v27 }
0x1ba2   :  { %1603 = vmatmul.msk.bf16.vlgmr.msrb.gmra.mxu3 %vm162_vm5, %v1067_v27  ;;  %1320 = vmatpush.bf16.msrb.mxu1 %v2047_v1 }
0x1ba3   :  { %1386 = vmatpush.bf16.msrb.mxu2 %v1998_v22  ;;  %1399 = vmatpush.bf16.msrb.mxu3 %v2039_v62 }
0x1ba6   :  { %1321 = vmatpush.bf16.msrb.mxu1 %v2056_v5 }
0x1ba7   :  { %1387 = vmatpush.bf16.msrb.mxu2 %v2004_v24  ;;  %1400 = vmatpush.bf16.msrb.mxu3 %v2050_v2 }
0x1c1e   :  { %v1080_v28 = vpop.f32.mrf.mxu1 }
0x1c1f   :  { %v1097_v29 = vadd.f32 %v2019_v35, %v1080_v28  ;;  %1100 = vrot.lane.b32.xlu0 %v1080_v28, %s1768_s8 }
0x1c21   :  { %1149 = vrot.lane.b32.xlu2 %v1097_v29, %s1766_s23 }
0x1c24   :  { %v1093_v3 = vpop.f32.mrf.mxu2 }
0x1c25   :  { %v2172_v26 = vpop.f32.mrf.mxu3  ;;  %1102 = vrot.lane.b32.xlu1 %v1093_v3, %s1768_s8 }
0x1c26   :  { %v1082_v22 = vpop.f32.mrf.mxu1 }
0x1c2c   :  { %v1095_v62 = vpop.f32.mrf.mxu2 }
0x1c2d   :  { %v1119_v30 = vpop.f32.mrf.mxu3 }
0x1c7b   :  { %v1150_v48 = vpop.permute.xlu2 %1149 }
0x1c91   :  { %v1101_v31 = vpop.permute.xlu0 %1100 }
0x1c97   :  { %v1103_v32 = vpop.permute.xlu1 %1102 }
0x1c98   :  { %v1104_v24 = vsel %vm162_vm5, %v1101_v31, %v1103_v32 }
0x1c99   :  { %v1106_v2 = vadd.f32 %v1104_v24, %v1004_v52 }
0x1c9b   :  { %v1107_v33 = vadd.f32 %v2102_v25, %v1106_v2 }
0x1c9d   :  { %v1128_v34 = vadd.f32 %v1107_v33, %v1097_v29 }
0x1c9f   :  { %v1604_v36 = vmul.f32 -1.442695, %v1128_v34 }
0x1ca1   :  { %1715 = vpow2.f32 %v1604_v36 }
0x1ca7   :  { %v1716_v38 = vpop.eup %1715 }
0x1ca8   :  { %v1132_v39 = vadd.f32 1.0, %v1716_v38 }
0x1caa   :  { %1717 = vrcp.f32 %v1132_v39  ;;  %v1144_v11 = vand.u32 2147483648, %v1132_v39  ;;  %v1142_v45 = vand.u32 2147483647, %v1132_v39  ;;  %vm1138_vm7 = vweird.f32 %v1132_v39 }
0x1cac   :  { %v1145_v47 = vor.u32 1.1754944e-38, %v1144_v11  ;;  %vm1143_vm9 = vcmp.eq.f32.partialorder %v1142_v45, 8.507059e+37 }
0x1cb0   :  { %v1718_v40 = vpop.eup %1717 }
0x1cb1   :  { %v1134_v41 = vmul.f32 %v1718_v40, %v1132_v39  ;;  %vm1139_vm6 = vweird.f32 %v1718_v40 }
0x1cb2   :  { %vm1140_vm8 = vmor %vm1138_vm7, %vm1139_vm6  ;;  %vm920_vm7 = vcmask 257152  }
0x1cb3   :  { %v1135_v42 = vsub.f32 1.0, %v1134_v41 }
0x1cb5   :  { %v1136_v44 = vmul.f32 %v1718_v40, %v1135_v42 }
0x1cb7   :  { %v1137_v46 = vadd.f32 %v1718_v40, %v1136_v44 }
0x1cb9   :  { %v1141_v14 = vsel %vm1140_vm8, %v1718_v40, %v1137_v46  ;;  %vm1023_vm8 = vcmask 388352  }
0x1cba   :  { %v1146_v20 = vsel %vm1143_vm9, %v1145_v47, %v1141_v14  ;;  %vm1126_vm9 = vcmask 519552  }
0x1cbb   :  { %v1152_v49 = vmul.f32 %v1150_v48, %v1146_v20  ;;  %v1159_v53 = vsub.f32 1.0, %v1146_v20  ;;  %v1165_v55 = vmul.f32 %v1146_v20, %v1063_v21 }
0x1cbd   :  { %1154 = vrot.lane.b32.xlu0 %v1152_v49, %s1766_s23 }
0x1d2f   :  { %v1155_v50 = vpop.permute.xlu0 %1154 }
0x1d30   :  { %v1157_v51 = vadd.f32 %v1155_v50, %v1107_v33 }
0x1d32   :  { %1719 = vtanh.f32 %v1157_v51 }
0x1d38   :  { %v1720_v52 = vpop.eup %1719 }
0x1d39   :  { %1161 = vrot.lane.b32.xlu1 %v1720_v52, %s1767_s3 }
0x1dab   :  { %v1162_v54 = vpop.permute.xlu1 %1161 }
0x1dac   :  { %v1164_v56 = vmul.f32 %v1162_v54, %v1159_v53 }
0x1dae   :  { %v1166_v57 = vadd.f32 %v1165_v55, %v1164_v56 }
0x1db0   :  { %v1167_v58 = vpack.c.bf16 %v1166_v57, %v1166_v57 }
0x1db2   :  { %1169 = vrot.lane.b32.xlu2 %v1167_v58, %s1767_s3 }
0x1e0c   :  { %v1170_v59 = vpop.permute.xlu2 %1169 }
0x1e0d   :  { %1605 = vmatmul.msk.bf16.vlgmr.msrb.gmra.mxu0 %vm162_vm5, %v1170_v59  ;;  %1606 = vmatmul.msk.bf16.vlgmr.msra.gmra.mxu1 %vm162_vm5, %v1170_v59 }
0x1e0e   :  { %1607 = vmatmul.msk.bf16.vlgmr.msra.gmra.mxu2 %vm162_vm5, %v1170_v59  ;;  %1423 = vmatpush.bf16.msrb.mxu0 %v2047_v1 }
0x1e0f   :  { %1489 = vmatpush.bf16.msra.mxu1 %v2047_v1 }
0x1e12   :  { %1424 = vmatpush.bf16.msrb.mxu0 %v2056_v5 }
0x1e13   :  { %1490 = vmatpush.bf16.msra.mxu1 %v2056_v5 }
0x1e8a   :  { %v1183_v60 = vpop.f32.mrf.mxu0  ;;  %v1196_v61 = vpop.f32.mrf.mxu1 }
0x1e8b   :  { %v1200_v63 = vadd.f32 %v2019_v35, %v1183_v60  ;;  %1203 = vrot.lane.b32.xlu0 %v1183_v60, %s1768_s8  ;;  %1205 = vrot.lane.b32.xlu1 %v1196_v61, %s1768_s8 }
0x1e8d   :  { %1252 = vrot.lane.b32.xlu2 %v1200_v63, %s1766_s23 }
0x1e91   :  { %v2191_v6 = vpop.f32.mrf.mxu2 }
0x1e92   :  { %v1185_v8 = vpop.f32.mrf.mxu0  ;;  %v1198_v9 = vpop.f32.mrf.mxu1 }
0x1e99   :  { %v1222_v10 = vpop.f32.mrf.mxu2 }
0x1ee7   :  { %v1253_v62 = vpop.permute.xlu2 %1252 }
0x1efd   :  { %v1204_v1 = vpop.permute.xlu0 %1203  ;;  %v1206_v7 = vpop.permute.xlu1 %1205 }
0x1efe   :  { %v1207_v12 = vsel %vm162_vm5, %v1204_v1, %v1206_v7 }
0x1eff   :  { %v1209_v5 = vadd.f32 %v1207_v12, %v1107_v33 }
0x1f01   :  { %v1210_v13 = vadd.f32 %v2102_v25, %v1209_v5 }
0x1f03   :  { %v1231_v15 = vadd.f32 %v1210_v13, %v1200_v63 }
0x1f05   :  { %v1608_v16 = vmul.f32 -1.442695, %v1231_v15 }
0x1f07   :  { %1721 = vpow2.f32 %v1608_v16 }
0x1f0d   :  { %v1722_v18 = vpop.eup %1721 }
0x1f0e   :  { %v1235_v4 = vadd.f32 1.0, %v1722_v18 }
0x1f10   :  { %1723 = vrcp.f32 %v1235_v4  ;;  %v1247_v23 = vand.u32 2147483648, %v1235_v4  ;;  %v1245_v28 = vand.u32 2147483647, %v1235_v4  ;;  %vm1241_vm11 = vweird.f32 %v1235_v4 }
0x1f12   :  { %v1248_v3 = vor.u32 1.1754944e-38, %v1247_v23  ;;  %vm1246_vm13 = vcmp.eq.f32.partialorder %v1245_v28, 8.507059e+37 }
0x1f16   :  { %v1724_v19 = vpop.eup %1723 }
0x1f17   :  { %v1237_v0 = vmul.f32 %v1724_v19, %v1235_v4  ;;  %vm1242_vm10 = vweird.f32 %v1724_v19 }
0x1f18   :  { %vm1243_vm12 = vmor %vm1241_vm11, %vm1242_vm10  ;;  %vm1229_vm10 = vcmask 650752   ;;  %vm1332_vm11 = vcmask 781952  }
0x1f19   :  { %v1238_v21 = vsub.f32 1.0, %v1237_v0 }
0x1f1b   :  { %v1239_v27 = vmul.f32 %v1724_v19, %v1238_v21 }
0x1f1d   :  { %v1240_v29 = vadd.f32 %v1724_v19, %v1239_v27 }
0x1f1f   :  { %v1244_v22 = vsel %vm1243_vm12, %v1724_v19, %v1240_v29  ;;  %vm1435_vm12 = vcmask 913152  }
0x1f20   :  { %v1249_v30 = vsel %vm1246_vm13, %v1248_v3, %v1244_v22  ;;  %vm1501_vm13 = vcmask 1044352  }
0x1f21   :  { %v1255_v31 = vmul.f32 %v1253_v62, %v1249_v30  ;;  %v1262_v33 = vsub.f32 1.0, %v1249_v30  ;;  %v1268_v36 = vmul.f32 %v1249_v30, %v1166_v57 }
0x1f23   :  { %1257 = vrot.lane.b32.xlu0 %v1255_v31, %s1766_s23 }
0x1f95   :  { %v1258_v32 = vpop.permute.xlu0 %1257 }
0x1f96   :  { %v1260_v24 = vadd.f32 %v1258_v32, %v1210_v13 }
0x1f98   :  { %1725 = vtanh.f32 %v1260_v24 }
0x1f9e   :  { %v1726_v2 = vpop.eup %1725 }
0x1f9f   :  { %1264 = vrot.lane.b32.xlu1 %v1726_v2, %s1767_s3 }
0x2011   :  { %v1265_v34 = vpop.permute.xlu1 %1264 }
0x2012   :  { %v1267_v38 = vmul.f32 %v1265_v34, %v1262_v33 }
0x2014   :  { %v1269_v39 = vadd.f32 %v1268_v36, %v1267_v38 }
0x2016   :  { %v1270_v40 = vpack.c.bf16 %v1269_v39, %v1269_v39 }
0x2018   :  { %1272 = vrot.lane.b32.xlu2 %v1270_v40, %s1767_s3 }
0x2072   :  { %v1273_v41 = vpop.permute.xlu2 %1272 }
0x2073   :  { %1609 = vmatmul.msk.bf16.vlgmr.msra.gmra.mxu3 %vm162_vm5, %v1273_v41  ;;  %1610 = vmatmul.msk.bf16.vlgmr.msra.gmra.mxu0 %vm162_vm5, %v1273_v41 }
0x2074   :  { %1611 = vmatmul.msk.bf16.vlgmr.msrb.gmra.mxu1 %vm162_vm5, %v1273_v41 }
0x20f0   :  { %v1299_v42 = vpop.f32.mrf.mxu0 }
0x20f1   :  { %v2201_v11 = vpop.f32.mrf.mxu1  ;;  %1308 = vrot.lane.b32.xlu1 %v1299_v42, %s1768_s8 }
0x20f6   :  { %v1286_v44 = vpop.f32.mrf.mxu3 }
0x20f7   :  { %v1303_v45 = vadd.f32 %v2019_v35, %v1286_v44  ;;  %1306 = vrot.lane.b32.xlu0 %v1286_v44, %s1768_s8 }
0x20f8   :  { %v1301_v46 = vpop.f32.mrf.mxu0 }
0x20f9   :  { %v1325_v47 = vpop.f32.mrf.mxu1  ;;  %1355 = vrot.lane.b32.xlu2 %v1303_v45, %s1766_s23 }
0x20fe   :  { %v1288_v14 = vpop.f32.mrf.mxu3 }
0x2153   :  { %v1356_v10 = vpop.permute.xlu2 %1355 }
0x2163   :  { %v1309_v48 = vpop.permute.xlu1 %1308 }
0x2169   :  { %v1307_v20 = vpop.permute.xlu0 %1306 }
0x216a   :  { %v1310_v49 = vsel %vm162_vm5, %v1307_v20, %v1309_v48  ;;  %v1118_v20 = vadd.f32 %v2089_v17, %v2172_v26 }
0x216b   :  { %v1312_v50 = vadd.f32 %v1310_v49, %v1210_v13  ;;  %v1221_v49 = vadd.f32 %v2089_v17, %v2191_v6 }
0x216d   :  { %v1313_v51 = vadd.f32 %v2102_v25, %v1312_v50  ;;  %v1121_v50 = vadd.f32 %v1118_v20, %v2148_v43 }
0x216f   :  { %v1334_v52 = vadd.f32 %v1313_v51, %v1303_v45 }
0x2171   :  { %v1612_v53 = vmul.f32 -1.442695, %v1334_v52 }
0x2173   :  { %1727 = vpow2.f32 %v1612_v53 }
0x2179   :  { %v1728_v54 = vpop.eup %1727 }
0x217a   :  { %v1338_v55 = vadd.f32 1.0, %v1728_v54 }
0x217c   :  { %1729 = vrcp.f32 %v1338_v55  ;;  %v1350_v59 = vand.u32 2147483648, %v1338_v55  ;;  %v1348_v61 = vand.u32 2147483647, %v1338_v55  ;;  %vm1344_vm15 = vweird.f32 %v1338_v55 }
0x217e   :  { %v1351_v8 = vor.u32 1.1754944e-38, %v1350_v59  ;;  %vm1349_vm2 = vcmp.eq.f32.partialorder %v1348_v61, 8.507059e+37 }
0x2182   :  { %v1730_v56 = vpop.eup %1729 }
0x2183   :  { %v1340_v57 = vmul.f32 %v1730_v56, %v1338_v55  ;;  %vm1345_vm14 = vweird.f32 %v1730_v56 }
0x2184   :  { %vm1346_vm1 = vmor %vm1344_vm15, %vm1345_vm14 }
0x2185   :  { %v1341_v58 = vsub.f32 1.0, %v1340_v57 }
0x2187   :  { %v1342_v60 = vmul.f32 %v1730_v56, %v1341_v58 }
0x2189   :  { %v1343_v63 = vadd.f32 %v1730_v56, %v1342_v60 }
0x218b   :  { %v1347_v9 = vsel %vm1346_vm1, %v1730_v56, %v1343_v63 }
0x218c   :  { %v1352_v1 = vsel %vm1349_vm2, %v1351_v8, %v1347_v9 }
0x218d   :  { %v1358_v7 = vmul.f32 %v1356_v10, %v1352_v1  ;;  %v1365_v15 = vsub.f32 1.0, %v1352_v1  ;;  %v1371_v18 = vmul.f32 %v1352_v1, %v1269_v39 }
0x218f   :  { %1360 = vrot.lane.b32.xlu0 %v1358_v7, %s1766_s23 }
0x2201   :  { %v1361_v12 = vpop.permute.xlu0 %1360 }
0x2202   :  { %v1363_v5 = vadd.f32 %v1361_v12, %v1313_v51 }
0x2204   :  { %1731 = vtanh.f32 %v1363_v5 }
0x220a   :  { %v1732_v13 = vpop.eup %1731 }
0x220b   :  { %1367 = vrot.lane.b32.xlu1 %v1732_v13, %s1767_s3 }
0x227d   :  { %v1368_v16 = vpop.permute.xlu1 %1367 }
0x227e   :  { %v1370_v4 = vmul.f32 %v1368_v16, %v1365_v15 }
0x2280   :  { %v2211_v19 = vadd.f32 %v1371_v18, %v1370_v4 }
0x2282   :  { %v1373_v0 = vpack.c.bf16 %v2211_v19, %v2211_v19 }
0x2284   :  { %1375 = vrot.lane.b32.xlu2 %v1373_v0, %s1767_s3 }
0x22de   :  { %v1376_v21 = vpop.permute.xlu2 %1375 }
0x22df   :  { %1613 = vmatmul.msk.bf16.vlgmr.msrb.gmra.mxu2 %vm162_vm5, %v1376_v21  ;;  %1614 = vmatmul.msk.bf16.vlgmr.msrb.gmra.mxu3 %vm162_vm5, %v1376_v21 }
0x22e0   :  { %1615 = vmatmul.msk.bf16.vlgmr.msrb.gmra.mxu0 %vm162_vm5, %v1376_v21 }
0x235d   :  { %v2219_v23 = vpop.f32.mrf.mxu0 }
0x2362   :  { %v1389_v27 = vpop.f32.mrf.mxu2  ;;  %v1402_v28 = vpop.f32.mrf.mxu3 }
0x2363   :  { %v1406_v29 = vadd.f32 %v2019_v35, %v1389_v27  ;;  %1409 = vrot.lane.b32.xlu0 %v1389_v27, %s1768_s8  ;;  %1411 = vrot.lane.b32.xlu1 %v1402_v28, %s1768_s8 }
0x2365   :  { %v1428_v3 = vpop.f32.mrf.mxu0  ;;  %1458 = vrot.lane.b32.xlu2 %v1406_v29, %s1766_s23 }
0x236a   :  { %v1391_v22 = vpop.f32.mrf.mxu2  ;;  %v1404_v62 = vpop.f32.mrf.mxu3 }
0x23d5   :  { %v1410_v30 = vpop.permute.xlu0 %1409  ;;  %v1412_v31 = vpop.permute.xlu1 %1411 }
0x23d6   :  { %v1413_v32 = vsel %vm162_vm5, %v1410_v30, %v1412_v31 }
0x23d7   :  { %v1415_v24 = vadd.f32 %v1413_v32, %v1313_v51  ;;  %v1224_v51 = vadd.f32 %v1221_v49, %v1121_v50 }
0x23d9   :  { %v1416_v2 = vadd.f32 %v2102_v25, %v1415_v24  ;;  %v1459_v25 = vpop.permute.xlu2 %1458 }
0x23db   :  { %v1437_v33 = vadd.f32 %v1416_v2, %v1406_v29 }
0x23dd   :  { %v1616_v34 = vmul.f32 -1.442695, %v1437_v33 }
0x23df   :  { %1733 = vpow2.f32 %v1616_v34 }
0x23e5   :  { %v1734_v35 = vpop.eup %1733 }
0x23e6   :  { %v1441_v36 = vadd.f32 1.0, %v1734_v35 }
0x23e8   :  { %1735 = vrcp.f32 %v1441_v36  ;;  %v1453_v41 = vand.u32 2147483648, %v1441_v36  ;;  %v1451_v44 = vand.u32 2147483647, %v1441_v36  ;;  %vm1447_vm3 = vweird.f32 %v1441_v36 }
0x23ea   :  { %v1454_v46 = vor.u32 1.1754944e-38, %v1453_v41  ;;  %vm1452_vm6 = vcmp.eq.f32.partialorder %v1451_v44, 8.507059e+37 }
0x23ee   :  { %v1736_v38 = vpop.eup %1735 }
0x23ef   :  { %v1443_v39 = vmul.f32 %v1736_v38, %v1441_v36  ;;  %vm1448_vm0 = vweird.f32 %v1736_v38 }
0x23f0   :  { %vm1449_vm4 = vmor %vm1447_vm3, %vm1448_vm0 }
0x23f1   :  { %v1444_v40 = vsub.f32 1.0, %v1443_v39 }
0x23f3   :  { %v1445_v42 = vmul.f32 %v1736_v38, %v1444_v40 }
0x23f5   :  { %v1446_v45 = vadd.f32 %v1736_v38, %v1445_v42 }
0x23f7   :  { %v1450_v47 = vsel %vm1449_vm4, %v1736_v38, %v1446_v45 }
0x23f8   :  { %v1455_v14 = vsel %vm1452_vm6, %v1454_v46, %v1450_v47 }
0x23f9   :  { %v1461_v48 = vmul.f32 %v1459_v25, %v1455_v14  ;;  %v1468_v6 = vsub.f32 1.0, %v1455_v14  ;;  %v1474_v57 = vmul.f32 %v1455_v14, %v2211_v19 }
0x23fb   :  { %1463 = vrot.lane.b32.xlu0 %v1461_v48, %s1766_s23 }
0x2403   :  { %917 = vrot.lane.b32.xlu0 %v2144_v37, %s1769_s10  ;;  %v1324_v37 = vadd.f32 %v2089_v17, %v2201_v11 }
0x2405   :  { %v1327_v26 = vadd.f32 %v1324_v37, %v1224_v51 }
0x240b   :  { %1226 = vrot.lane.b32.xlu0 %v1224_v51, %s1766_s23  ;;  %s1770_s23 = smov 80  }
0x246d   :  { %v1464_v52 = vpop.permute.xlu0 %1463 }
0x246e   :  { %v1466_v53 = vadd.f32 %v1464_v52, %v1416_v2 }
0x2470   :  { %1737 = vtanh.f32 %v1466_v53 }
0x2475   :  { %v918_v54 = vpop.permute.xlu0 %917 }
0x2476   :  { %v1738_v55 = vpop.eup %1737  ;;  %921 = vst.msk [vmem:[%s2285_s13] sm:$0xf] %vm920_vm7, %v918_v54 }
0x2477   :  { %1470 = vrot.lane.b32.xlu1 %v1738_v55, %s1767_s3 }
0x247d   :  { %v1227_v9 = vpop.permute.xlu0 %1226 }
0x247f   :  { %1020 = vrot.lane.b32.xlu1 %v2148_v43, %s1768_s8  ;;  %v1427_v43 = vadd.f32 %v2089_v17, %v2219_v23 }
0x2481   :  { %v1430_v11 = vadd.f32 %v1427_v43, %v1327_v26 }
0x2487   :  { %1329 = vrot.lane.b32.xlu1 %v1327_v26, %s1770_s23 }
0x24e9   :  { %v1471_v56 = vpop.permute.xlu1 %1470 }
0x24ea   :  { %v1473_v58 = vmul.f32 %v1471_v56, %v1468_v6 }
0x24ec   :  { %v1475_v59 = vadd.f32 %v1474_v57, %v1473_v58 }
0x24ee   :  { %1504 = vrot.lane.b32.xlu0 %v1475_v59, %s1767_s3  ;;  %v1476_v60 = vpack.c.bf16 %v1475_v59, %v1475_v59 }
0x24f0   :  { %1478 = vrot.lane.b32.xlu2 %v1476_v60, %s1767_s3 }
0x24f1   :  { %v1021_v61 = vpop.permute.xlu1 %1020 }
0x24f2   :  { %1024 = vst.msk [vmem:[%s2285_s13] sm:$0xf] %vm1023_vm8, %v1021_v61 }
0x24f8   :  { %1123 = vrot.lane.b32.xlu2 %v1121_v50, %s1771_s2 }
0x24f9   :  { %v1330_v10 = vpop.permute.xlu1 %1329 }
0x2500   :  { %1432 = vrot.lane.b32.xlu2 %v1430_v11, %s1767_s3 }
0x254a   :  { %v1479_v63 = vpop.permute.xlu2 %1478 }
0x254b   :  { %1617 = vmatmul.msk.bf16.vlgmr.msra.gmra.mxu1 %vm162_vm5, %v1479_v63  ;;  %vm1507_vm5 = vcmask 257024  }
0x2552   :  { %v1124_v8 = vpop.permute.xlu2 %1123 }
0x2553   :  { %1127 = vst.msk [vmem:[%s2285_s13] sm:$0xf] %vm1126_vm9, %v1124_v8 }
0x2554   :  { %1230 = vst.msk [vmem:[%s2285_s13] sm:$0xf] %vm1229_vm10, %v1227_v9 }
0x2555   :  { %1333 = vst.msk [vmem:[%s2285_s13] sm:$0xf] %vm1332_vm11, %v1330_v10 }
0x255a   :  { %v1433_v1 = vpop.permute.xlu2 %1432 }
0x255b   :  { %1436 = vst.msk [vmem:[%s2285_s13] sm:$0xf] %vm1435_vm12, %v1433_v1 }
0x2560   :  { %v1505_v7 = vpop.permute.xlu0 %1504 }
0x2561   :  { %1508 = vst.msk [vmem:[#allocation2] sm:$0xf] %vm1507_vm5, %v1505_v7 }
0x2562   :  { %1521 = dma.vmem_to_hbm [thread:$0]  %s1517_s28, 64, %s1519_s29, [#allocation3]  }
0x25c8   :  { %v1492_v12 = vpop.f32.mrf.mxu1 }
0x25c9   :  { %v1493_v5 = vadd.f32 %v2089_v17, %v1492_v12 }
0x25cb   :  { %v1496_v13 = vadd.f32 %v1493_v5, %v1430_v11 }
0x25cd   :  { %1498 = vrot.lane.b32.xlu1 %v1496_v13, %s1773_s30 }
0x25d0   :  { %v1494_v15 = vpop.f32.mrf.mxu1 }
0x263f   :  { %v1499_v16 = vpop.permute.xlu1 %1498 }
0x2640   :  { %1502 = vst.msk [vmem:[%s2285_s13] sm:$0xf] %vm1501_vm13, %v1499_v16 }
0x2641   :  { %1763 = dma.done.wait [#allocation3], 64  }
0x2642   :  { %1764 = vsyncadd [#allocation3], 4294967232 }
0x2643   :  { %1528 = vsyncpa [#allocation3], 1 }

</bundles_post_ra>
